<compile_context>
chip_gen: v7x
topology: tpu7x:2x2x1
jax: 0.10.0
libtpu: 0.0.40
codegen_flags: <defaults>
</compile_context>

<pallas_src>
import functools

import jax
import jax.numpy as jnp
from jax.experimental import pallas as pl
from jax.experimental.pallas import tpu as pltpu


def _round_up(x, m):
    return (x + m - 1) // m * m


def _nbytes(shape, dtype):
    n = 1
    for s in shape:
        n *= int(s)
    return n * jnp.dtype(dtype).itemsize


# ---------------------------------------------------------------------------
# Kernel: DMA embedding gather + L LSTM cells (v==0) + per-tile projection
# ---------------------------------------------------------------------------

def _decoder_step_kernel(tok_ref,                       # SMEM  [Bp]        int32 (prefetch)
                         emb_hbm_ref,                   # HBM   [V, E]      f32
                         wcat_ref,                      # VMEM  [L, K, 4H]  bf16 ([wih_T;0;whh_T])
                         b_ref,                         # VMEM  [L, 1, 4H]  f32  (bias_ih+bias_hh)
                         wout_ref,                      # VMEM  [H, TILE_V] bf16 (vocab tile)
                         bout_ref,                      # VMEM  [1, TILE_V] f32
                         h_in_ref, c_in_ref,            # VMEM  [L, Bp, H]  f32
                         pred_ref,                      # VMEM  [Bp, TILE_V] f32
                         h_out_ref, c_out_ref,          # VMEM  [L, Bp, H]  f32
                         emb_vmem,                      # scratch [Bp, E]   f32
                         xh_ref,                        # scratch [Bp, K]   bf16
                         hlast_ref,                     # scratch [Bp, H]   bf16
                         gather_sem,                    # scratch DMA sems [Bp]
                         *, emb_dim, hid_dim, num_layers, matmul_dtype):
    Bp = xh_ref.shape[0]
    E = emb_dim
    H = hid_dim
    d_in = max(E, H)                 # uniform per-layer input width

    @pl.when(pl.program_id(0) == 0)
    def _lstm_step():
        # --- 1) Embedding row gather: Bp tiny DMAs straight from HBM.
        copies = []
        for b in range(Bp):
            cp = pltpu.make_async_copy(emb_hbm_ref.at[tok_ref[b]],
                                       emb_vmem.at[b],
                                       gather_sem.at[b])
            cp.start()
            copies.append(cp)

        # Zero the [x, h] staging buffer once (pad columns must be finite so
        # the zero weight rows cannot produce NaN * 0).  Overlaps with DMAs.
        xh_ref[...] = jnp.zeros(xh_ref.shape, xh_ref.dtype)

        for cp in copies:
            cp.wait()
        xh_ref[:, :E] = emb_vmem[...].astype(matmul_dtype)

        # --- 2) num_layers LSTM cells.  Gate columns packed as [i | f | o | g].
        h_new = None
        for l in range(num_layers):
            h_prev = h_in_ref[l]                                  # [Bp, H] f32
            c_prev = c_in_ref[l]                                  # [Bp, H] f32
            xh_ref[:, d_in:] = h_prev.astype(matmul_dtype)        # h half of [x, h]
            gates = (jnp.dot(xh_ref[...], wcat_ref[l],
                             preferred_element_type=jnp.float32)
                     + b_ref[l])                                  # [Bp, 4H] f32
            sig = jax.nn.sigmoid(gates[:, :3 * H])                # i | f | o in one slab
            g_g = jnp.tanh(gates[:, 3 * H:])
            i_g = sig[:, 0 * H:1 * H]
            f_g = sig[:, 1 * H:2 * H]
            o_g = sig[:, 2 * H:3 * H]
            c_new = f_g * c_prev + i_g * g_g
            h_new = o_g * jnp.tanh(c_new)
            h_out_ref[l] = h_new
            c_out_ref[l] = c_new
            if l + 1 < num_layers:
                xh_ref[:, :H] = h_new.astype(matmul_dtype)        # next layer's x half

        # Last-layer hidden stays resident (bf16) for every vocab tile.
        hlast_ref[...] = h_new.astype(matmul_dtype)

    # --- 3) Output projection for this vocab tile (runs every grid step).
    pred_ref[...] = (jnp.dot(hlast_ref[...], wout_ref[...],
                             preferred_element_type=jnp.float32)
                     + bout_ref[...])


# ---------------------------------------------------------------------------
# Decoder factory: init() packs weights, apply() runs the fused kernel
# ---------------------------------------------------------------------------

def make_decoder(output_dim, emb_dim, hid_dim, num_layers, dropout=0.0,
                 matmul_dtype=jnp.bfloat16):
    del dropout  # eval-mode dropout == identity (see TODO above)
    V, E, H, L = output_dim, emb_dim, hid_dim, num_layers
    Vp = _round_up(V, 128)                    # lane-dense vocab padding
    d_in = max(E, H)
    K = d_in + H                              # concatenated [x, h] contraction dim

    # Vocab tile width for the streamed output projection.
    TILE_V = 128
    for cand in (512, 384, 256, 128):
        if Vp % cand == 0:
            TILE_V = cand
            break
    num_v_tiles = Vp // TILE_V

    def init(key):
        keys = jax.random.split(key, 3 + 4 * L)
        k_it = iter(keys)

        emb = jax.random.normal(next(k_it), (V, E), jnp.float32) * 0.1

        def repack_rows(m):
            # PyTorch nn.LSTM packs gate rows as [i | f | g | o]; the kernel
            # wants [i | f | o | g] so sigmoid/tanh each cover one slab.
            return jnp.concatenate(
                [m[0 * H:1 * H], m[1 * H:2 * H], m[3 * H:4 * H], m[2 * H:3 * H]],
                axis=0)

        wcat_list, bias_list = [], []
        for l in range(L):
            in_dim = E if l == 0 else H
            w_ih = jax.random.normal(next(k_it), (4 * H, in_dim), jnp.float32) * 0.1
            w_hh = jax.random.normal(next(k_it), (4 * H, H), jnp.float32) * 0.1
            b_ih = jax.random.normal(next(k_it), (4 * H,), jnp.float32) * 0.1
            b_hh = jax.random.normal(next(k_it), (4 * H,), jnp.float32) * 0.1

            w_ih = repack_rows(w_ih)
            w_hh = repack_rows(w_hh)
            bias = repack_rows((b_ih + b_hh)[:, None])[:, 0]

            w_cat = jnp.zeros((K, 4 * H), jnp.float32)
            w_cat = w_cat.at[:in_dim, :].set(w_ih.T)              # x part
            w_cat = w_cat.at[d_in:d_in + H, :].set(w_hh.T)        # h part
            wcat_list.append(w_cat)
            bias_list.append(bias[None, :])

        w_out = jax.random.normal(next(k_it), (V, H), jnp.float32) * 0.1
        b_out = jax.random.normal(next(k_it), (V,), jnp.float32) * 0.1
        w_out_T = jnp.zeros((H, Vp), jnp.float32).at[:, :V].set(w_out.T)
        b_out_p = jnp.zeros((1, Vp), jnp.float32).at[0, :V].set(b_out)

        return {
            "embedding": emb,                                      # f32 [V, E] (HBM, row-gathered)
            "w_cat_T": jnp.stack(wcat_list).astype(matmul_dtype),  # [L, K, 4H]
            "bias": jnp.stack(bias_list),                          # [L, 1, 4H] f32
            "w_out_T": w_out_T.astype(matmul_dtype),               # [H, Vp]
            "b_out": b_out_p,                                      # [1, Vp] f32
        }

    kernel = functools.partial(
        _decoder_step_kernel, emb_dim=E, hid_dim=H, num_layers=L,
        matmul_dtype=matmul_dtype)

    @jax.jit
    def apply(params, tokens, hidden, cell):
        """tokens [B] int32; hidden/cell [L,B,H] f32 -> (pred [B,V], hidden, cell)."""
        B = tokens.shape[0]
        Bp = _round_up(B, 16)                 # bf16 packs 16 rows per vreg

        tok_p = tokens.astype(jnp.int32)
        if Bp > B:
            tok_p = jnp.pad(tok_p, (0, Bp - B))          # pad tokens -> row 0 (in-bounds)
            hidden_p = jnp.pad(hidden, ((0, 0), (0, Bp - B), (0, 0)))
            cell_p = jnp.pad(cell, ((0, 0), (0, Bp - B), (0, 0)))
        else:
            hidden_p, cell_p = hidden, cell

        grid_spec = pltpu.PrefetchScalarGridSpec(
            num_scalar_prefetch=1,
            grid=(num_v_tiles,),
            in_specs=[
                pl.BlockSpec(memory_space=pl.ANY),                      # embedding stays in HBM
                pl.BlockSpec((L, K, 4 * H), lambda v, tok: (0, 0, 0)),  # stacked LSTM weights
                pl.BlockSpec((L, 1, 4 * H), lambda v, tok: (0, 0, 0)),  # folded biases
                pl.BlockSpec((H, TILE_V), lambda v, tok: (0, v)),       # streamed w_out tile
                pl.BlockSpec((1, TILE_V), lambda v, tok: (0, v)),       # b_out tile
                pl.BlockSpec((L, Bp, H), lambda v, tok: (0, 0, 0)),     # h_in
                pl.BlockSpec((L, Bp, H), lambda v, tok: (0, 0, 0)),     # c_in
            ],
            out_specs=[
                pl.BlockSpec((Bp, TILE_V), lambda v, tok: (0, v)),      # prediction tile
                pl.BlockSpec((L, Bp, H), lambda v, tok: (0, 0, 0)),     # h_out
                pl.BlockSpec((L, Bp, H), lambda v, tok: (0, 0, 0)),     # c_out
            ],
            scratch_shapes=[
                pltpu.VMEM((Bp, E), jnp.float32),       # gathered embedding rows
                pltpu.VMEM((Bp, K), matmul_dtype),      # persistent [x, h] staging buffer
                pltpu.VMEM((Bp, H), matmul_dtype),      # last-layer hidden (all vocab tiles)
                pltpu.SemaphoreType.DMA((Bp,)),         # per-row gather semaphores
            ],
        )

        # Right-size the VMEM request: x2 per BlockSpec operand for double
        # buffering, plus scratch; clamp below v7x's 64 MiB physical ceiling.
        vmem_est = 2 * (
            _nbytes((L, K, 4 * H), matmul_dtype)
            + _nbytes((L, 8, 4 * H), jnp.float32)
            + _nbytes((H, TILE_V), matmul_dtype)
            + _nbytes((8, TILE_V), jnp.float32)
            + 2 * _nbytes((L, Bp, H), jnp.float32)          # h_in, c_in
            + _nbytes((Bp, TILE_V), jnp.float32)            # pred tile
            + 2 * _nbytes((L, Bp, H), jnp.float32)          # h_out, c_out
        ) + (_nbytes((Bp, max(E, 128)), jnp.float32)
             + _nbytes((Bp, max(K, 128)), matmul_dtype)
             + _nbytes((Bp, max(H, 128)), matmul_dtype))
        vmem_limit = int(min(max(2 * vmem_est, 16 * 1024 * 1024),
                             56 * 1024 * 1024))

        flops = L * 2 * Bp * K * 4 * H + 2 * Bp * H * Vp
        transcendentals = L * Bp * 8 * H          # sigmoid ~ exp+recip over 3H, tanh over 2H
        bytes_accessed = int(
            Bp * 4 + Bp * E * 4                                   # tokens + gathered rows
            + _nbytes((L, K, 4 * H), matmul_dtype)
            + _nbytes((L, 1, 4 * H), jnp.float32)
            + _nbytes((H, Vp), matmul_dtype) + _nbytes((1, Vp), jnp.float32)
            + 4 * _nbytes((L, Bp, H), jnp.float32)
            + _nbytes((Bp, Vp), jnp.float32))

        pred_p, h_new, c_new = pl.pallas_call(
            kernel,
            out_shape=(jax.ShapeDtypeStruct((Bp, Vp), jnp.float32),
                       jax.ShapeDtypeStruct((L, Bp, H), jnp.float32),
                       jax.ShapeDtypeStruct((L, Bp, H), jnp.float32)),
            grid_spec=grid_spec,
            input_output_aliases={6: 1, 7: 2},    # hidden/cell updated in place
            compiler_params=pltpu.CompilerParams(
                dimension_semantics=("arbitrary",),
                vmem_limit_bytes=vmem_limit),
            cost_estimate=pl.CostEstimate(flops=flops,
                                          transcendentals=transcendentals,
                                          bytes_accessed=bytes_accessed),
        )(tok_p, params["embedding"], params["w_cat_T"], params["bias"],
          params["w_out_T"], params["b_out"], hidden_p, cell_p)

        return pred_p[:B, :V], h_new[:, :B, :], c_new[:, :B, :]

    return init, apply


# ---------------------------------------------------------------------------
# Pure-JAX reference (same packed weights, all-f32 math) for verification
# ---------------------------------------------------------------------------

def _reference_forward(params, tokens, hidden, cell, *, emb_dim, hid_dim,
                       num_layers, output_dim):
    E, H, L, V = emb_dim, hid_dim, num_layers, output_dim
    d_in = max(E, H)
    emb = params["embedding"].astype(jnp.float32)
    wcat = params["w_cat_T"].astype(jnp.float32)
    bias = params["bias"].astype(jnp.float32)
    w_out = params["w_out_T"].astype(jnp.float32)
    b_out = params["b_out"].astype(jnp.float32)

    x = emb[tokens]                                        # [B, E]
    new_h, new_c = [], []
    for l in range(L):
        in_dim = E if l == 0 else H
        w_ih = wcat[l, :in_dim, :]
        w_hh = wcat[l, d_in:d_in + H, :]
        gates = x @ w_ih + hidden[l] @ w_hh + bias[l]
        # Packed gate order is [i | f | o | g].
        i_g = jax.nn.sigmoid(gates[:, 0 * H:1 * H])
        f_g = jax.nn.sigmoid(gates[:, 1 * H:2 * H])
        o_g = jax.nn.sigmoid(gates[:, 2 * H:3 * H])
        g_g = jnp.tanh(gates[:, 3 * H:4 * H])
        c_n = f_g * cell[l] + i_g * g_g
        h_n = o_g * jnp.tanh(c_n)
        new_h.append(h_n)
        new_c.append(c_n)
        x = h_n
    pred = x @ w_out[:, :V] + b_out[:, :V]
    return pred, jnp.stack(new_h), jnp.stack(new_c)


# ---------------------------------------------------------------------------
# Main
# ---------------------------------------------------------------------------

if __name__ == "__main__":
    OUTPUT_DIM = 64   # vocab size
    EMB_DIM = 32
    HID_DIM = 32
    NUM_LAYERS = 2
    BATCH = 4
    DROPOUT = 0.0

    init_fn, apply_fn = make_decoder(OUTPUT_DIM, EMB_DIM, HID_DIM, NUM_LAYERS,
                                     DROPOUT)

    key = jax.random.PRNGKey(0)
    k_par, k_tok, k_h, k_c = jax.random.split(key, 4)

    params = init_fn(k_par)
    tokens = jax.random.randint(k_tok, (BATCH,), 0, OUTPUT_DIM, dtype=jnp.int32)
    hidden = jax.random.normal(k_h, (NUM_LAYERS, BATCH, HID_DIM), jnp.float32)
    cell = jax.random.normal(k_c, (NUM_LAYERS, BATCH, HID_DIM), jnp.float32)

    prediction, new_hidden, new_cell = apply_fn(params, tokens, hidden, cell)
    jax.block_until_ready((prediction, new_hidden, new_cell))

    assert prediction.shape == (BATCH, OUTPUT_DIM)
    assert new_hidden.shape == (NUM_LAYERS, BATCH, HID_DIM)
    assert new_cell.shape == (NUM_LAYERS, BATCH, HID_DIM)

    ref_pred, ref_h, ref_c = _reference_forward(
        params, tokens, hidden, cell, emb_dim=EMB_DIM, hid_dim=HID_DIM,
        num_layers=NUM_LAYERS, output_dim=OUTPUT_DIM)
    assert jnp.allclose(prediction, ref_pred, atol=2e-2, rtol=2e-2)
    assert jnp.allclose(new_hidden, ref_h, atol=2e-2, rtol=2e-2)
    assert jnp.allclose(new_cell, ref_c, atol=2e-2, rtol=2e-2)

    print("KERNEL_OK")
</pallas_src>

<mosaic_0001>
module attributes {stable_mosaic.version = 11 : i64} {
  func.func @_decoder_step_kernel(%arg0: i32, %arg1: memref<16xi32, #tpu.memory_space<smem>>, %arg2: memref<64x32xf32, #tpu.memory_space<any>>, %arg3: memref<2x64x128xbf16, #tpu.memory_space<vmem>>, %arg4: memref<2x1x128xf32, #tpu.memory_space<vmem>>, %arg5: memref<32x128xbf16, #tpu.memory_space<vmem>>, %arg6: memref<1x128xf32, #tpu.memory_space<vmem>>, %arg7: memref<2x16x32xf32, #tpu.memory_space<vmem>>, %arg8: memref<2x16x32xf32, #tpu.memory_space<vmem>>, %arg9: memref<16x128xf32, #tpu.memory_space<vmem>>, %arg10: memref<2x16x32xf32, #tpu.memory_space<vmem>>, %arg11: memref<2x16x32xf32, #tpu.memory_space<vmem>>, %arg12: memref<16x32xf32, #tpu.memory_space<vmem>>, %arg13: memref<16x64xbf16, #tpu.memory_space<vmem>>, %arg14: memref<16x32xbf16, #tpu.memory_space<vmem>>, %arg15: memref<16x!tpu.dma_semaphore, #tpu.memory_space<semaphore_mem>>) attributes {dimension_semantics = [#tpu.dimension_semantics<arbitrary>], iteration_bounds = array<i64: 1>, scalar_prefetch = 1 : i64, scratch_operands = 4 : i64, tpu.core_type = #tpu.core_type<tc>, window_params = [{}, {pipeline_mode = #tpu.pipeline_mode<synchronous>, transform_indices = @transform_1, window_bounds = array<i64: 2, 64, 128>}, {pipeline_mode = #tpu.pipeline_mode<synchronous>, transform_indices = @transform_2, window_bounds = array<i64: 2, 1, 128>}, {transform_indices = @transform_3, window_bounds = array<i64: 32, 128>}, {transform_indices = @transform_4, window_bounds = array<i64: 1, 128>}, {pipeline_mode = #tpu.pipeline_mode<synchronous>, transform_indices = @transform_5, window_bounds = array<i64: 2, 16, 32>}, {pipeline_mode = #tpu.pipeline_mode<synchronous>, transform_indices = @transform_6, window_bounds = array<i64: 2, 16, 32>}, {transform_indices = @transform_7, window_bounds = array<i64: 16, 128>}, {pipeline_mode = #tpu.pipeline_mode<synchronous>, transform_indices = @transform_8, window_bounds = array<i64: 2, 16, 32>}, {pipeline_mode = #tpu.pipeline_mode<synchronous>, transform_indices = @transform_9, window_bounds = array<i64: 2, 16, 32>}]} {
    %c0_i32 = arith.constant 0 : i32
    %0 = arith.cmpi eq, %arg0, %c0_i32 : i32
    %1 = arith.extui %0 : i1 to i32
    %c0_i32_0 = arith.constant 0 : i32
    %2 = arith.cmpi ne, %1, %c0_i32_0 : i32
    scf.if %2 {
      %c0_8 = arith.constant 0 : index
      %10 = memref.load %arg1[%c0_8] : memref<16xi32, #tpu.memory_space<smem>>
      %c0_i32_9 = arith.constant 0 : i32
      %c0_i32_10 = arith.constant 0 : i32
      %c0_i32_11 = arith.constant 0 : i32
      %11 = tpu.memref_slice %arg2[%10, %c0_i32_11] : memref<64x32xf32, #tpu.memory_space<any>> -> memref<1x32xf32, #tpu.memory_space<any>>
      %12 = tpu.memref_squeeze %11 : memref<1x32xf32, #tpu.memory_space<any>> -> memref<32xf32, #tpu.memory_space<any>>
      %c0_i32_12 = arith.constant 0 : i32
      %13 = tpu.memref_slice %arg12[%c0_i32_9, %c0_i32_12] : memref<16x32xf32, #tpu.memory_space<vmem>> -> memref<1x32xf32, #tpu.memory_space<vmem>>
      %14 = tpu.memref_squeeze %13 : memref<1x32xf32, #tpu.memory_space<vmem>> -> memref<32xf32, #tpu.memory_space<vmem>>
      %15 = tpu.memref_slice %arg15[%c0_i32_10] : memref<16x!tpu.dma_semaphore, #tpu.memory_space<semaphore_mem>> -> memref<1x!tpu.dma_semaphore, #tpu.memory_space<semaphore_mem>>
      %16 = tpu.memref_squeeze %15 : memref<1x!tpu.dma_semaphore, #tpu.memory_space<semaphore_mem>> -> memref<!tpu.dma_semaphore, #tpu.memory_space<semaphore_mem>>
      tpu.enqueue_dma source(%12 : memref<32xf32, #tpu.memory_space<any>>) target(%14 : memref<32xf32, #tpu.memory_space<vmem>>) target_semaphore(%16 : memref<!tpu.dma_semaphore, #tpu.memory_space<semaphore_mem>>)
      %c1 = arith.constant 1 : index
      %17 = memref.load %arg1[%c1] : memref<16xi32, #tpu.memory_space<smem>>
      %c1_i32 = arith.constant 1 : i32
      %c1_i32_13 = arith.constant 1 : i32
      %c0_i32_14 = arith.constant 0 : i32
      %18 = tpu.memref_slice %arg2[%17, %c0_i32_14] : memref<64x32xf32, #tpu.memory_space<any>> -> memref<1x32xf32, #tpu.memory_space<any>>
      %19 = tpu.memref_squeeze %18 : memref<1x32xf32, #tpu.memory_space<any>> -> memref<32xf32, #tpu.memory_space<any>>
      %c0_i32_15 = arith.constant 0 : i32
      %20 = tpu.memref_slice %arg12[%c1_i32, %c0_i32_15] : memref<16x32xf32, #tpu.memory_space<vmem>> -> memref<1x32xf32, #tpu.memory_space<vmem>>
      %21 = tpu.memref_squeeze %20 : memref<1x32xf32, #tpu.memory_space<vmem>> -> memref<32xf32, #tpu.memory_space<vmem>>
      %22 = tpu.memref_slice %arg15[%c1_i32_13] : memref<16x!tpu.dma_semaphore, #tpu.memory_space<semaphore_mem>> -> memref<1x!tpu.dma_semaphore, #tpu.memory_space<semaphore_mem>>
      %23 = tpu.memref_squeeze %22 : memref<1x!tpu.dma_semaphore, #tpu.memory_space<semaphore_mem>> -> memref<!tpu.dma_semaphore, #tpu.memory_space<semaphore_mem>>
      tpu.enqueue_dma source(%19 : memref<32xf32, #tpu.memory_space<any>>) target(%21 : memref<32xf32, #tpu.memory_space<vmem>>) target_semaphore(%23 : memref<!tpu.dma_semaphore, #tpu.memory_space<semaphore_mem>>)
      %c2 = arith.constant 2 : index
      %24 = memref.load %arg1[%c2] : memref<16xi32, #tpu.memory_space<smem>>
      %c2_i32 = arith.constant 2 : i32
      %c2_i32_16 = arith.constant 2 : i32
      %c0_i32_17 = arith.constant 0 : i32
      %25 = tpu.memref_slice %arg2[%24, %c0_i32_17] : memref<64x32xf32, #tpu.memory_space<any>> -> memref<1x32xf32, #tpu.memory_space<any>>
      %26 = tpu.memref_squeeze %25 : memref<1x32xf32, #tpu.memory_space<any>> -> memref<32xf32, #tpu.memory_space<any>>
      %c0_i32_18 = arith.constant 0 : i32
      %27 = tpu.memref_slice %arg12[%c2_i32, %c0_i32_18] : memref<16x32xf32, #tpu.memory_space<vmem>> -> memref<1x32xf32, #tpu.memory_space<vmem>>
      %28 = tpu.memref_squeeze %27 : memref<1x32xf32, #tpu.memory_space<vmem>> -> memref<32xf32, #tpu.memory_space<vmem>>
      %29 = tpu.memref_slice %arg15[%c2_i32_16] : memref<16x!tpu.dma_semaphore, #tpu.memory_space<semaphore_mem>> -> memref<1x!tpu.dma_semaphore, #tpu.memory_space<semaphore_mem>>
      %30 = tpu.memref_squeeze %29 : memref<1x!tpu.dma_semaphore, #tpu.memory_space<semaphore_mem>> -> memref<!tpu.dma_semaphore, #tpu.memory_space<semaphore_mem>>
      tpu.enqueue_dma source(%26 : memref<32xf32, #tpu.memory_space<any>>) target(%28 : memref<32xf32, #tpu.memory_space<vmem>>) target_semaphore(%30 : memref<!tpu.dma_semaphore, #tpu.memory_space<semaphore_mem>>)
      %c3 = arith.constant 3 : index
      %31 = memref.load %arg1[%c3] : memref<16xi32, #tpu.memory_space<smem>>
      %c3_i32 = arith.constant 3 : i32
      %c3_i32_19 = arith.constant 3 : i32
      %c0_i32_20 = arith.constant 0 : i32
      %32 = tpu.memref_slice %arg2[%31, %c0_i32_20] : memref<64x32xf32, #tpu.memory_space<any>> -> memref<1x32xf32, #tpu.memory_space<any>>
      %33 = tpu.memref_squeeze %32 : memref<1x32xf32, #tpu.memory_space<any>> -> memref<32xf32, #tpu.memory_space<any>>
      %c0_i32_21 = arith.constant 0 : i32
      %34 = tpu.memref_slice %arg12[%c3_i32, %c0_i32_21] : memref<16x32xf32, #tpu.memory_space<vmem>> -> memref<1x32xf32, #tpu.memory_space<vmem>>
      %35 = tpu.memref_squeeze %34 : memref<1x32xf32, #tpu.memory_space<vmem>> -> memref<32xf32, #tpu.memory_space<vmem>>
      %36 = tpu.memref_slice %arg15[%c3_i32_19] : memref<16x!tpu.dma_semaphore, #tpu.memory_space<semaphore_mem>> -> memref<1x!tpu.dma_semaphore, #tpu.memory_space<semaphore_mem>>
      %37 = tpu.memref_squeeze %36 : memref<1x!tpu.dma_semaphore, #tpu.memory_space<semaphore_mem>> -> memref<!tpu.dma_semaphore, #tpu.memory_space<semaphore_mem>>
      tpu.enqueue_dma source(%33 : memref<32xf32, #tpu.memory_space<any>>) target(%35 : memref<32xf32, #tpu.memory_space<vmem>>) target_semaphore(%37 : memref<!tpu.dma_semaphore, #tpu.memory_space<semaphore_mem>>)
      %c4 = arith.constant 4 : index
      %38 = memref.load %arg1[%c4] : memref<16xi32, #tpu.memory_space<smem>>
      %c4_i32 = arith.constant 4 : i32
      %c4_i32_22 = arith.constant 4 : i32
      %c0_i32_23 = arith.constant 0 : i32
      %39 = tpu.memref_slice %arg2[%38, %c0_i32_23] : memref<64x32xf32, #tpu.memory_space<any>> -> memref<1x32xf32, #tpu.memory_space<any>>
      %40 = tpu.memref_squeeze %39 : memref<1x32xf32, #tpu.memory_space<any>> -> memref<32xf32, #tpu.memory_space<any>>
      %c0_i32_24 = arith.constant 0 : i32
      %41 = tpu.memref_slice %arg12[%c4_i32, %c0_i32_24] : memref<16x32xf32, #tpu.memory_space<vmem>> -> memref<1x32xf32, #tpu.memory_space<vmem>>
      %42 = tpu.memref_squeeze %41 : memref<1x32xf32, #tpu.memory_space<vmem>> -> memref<32xf32, #tpu.memory_space<vmem>>
      %43 = tpu.memref_slice %arg15[%c4_i32_22] : memref<16x!tpu.dma_semaphore, #tpu.memory_space<semaphore_mem>> -> memref<1x!tpu.dma_semaphore, #tpu.memory_space<semaphore_mem>>
      %44 = tpu.memref_squeeze %43 : memref<1x!tpu.dma_semaphore, #tpu.memory_space<semaphore_mem>> -> memref<!tpu.dma_semaphore, #tpu.memory_space<semaphore_mem>>
      tpu.enqueue_dma source(%40 : memref<32xf32, #tpu.memory_space<any>>) target(%42 : memref<32xf32, #tpu.memory_space<vmem>>) target_semaphore(%44 : memref<!tpu.dma_semaphore, #tpu.memory_space<semaphore_mem>>)
      %c5 = arith.constant 5 : index
      %45 = memref.load %arg1[%c5] : memref<16xi32, #tpu.memory_space<smem>>
      %c5_i32 = arith.constant 5 : i32
      %c5_i32_25 = arith.constant 5 : i32
      %c0_i32_26 = arith.constant 0 : i32
      %46 = tpu.memref_slice %arg2[%45, %c0_i32_26] : memref<64x32xf32, #tpu.memory_space<any>> -> memref<1x32xf32, #tpu.memory_space<any>>
      %47 = tpu.memref_squeeze %46 : memref<1x32xf32, #tpu.memory_space<any>> -> memref<32xf32, #tpu.memory_space<any>>
      %c0_i32_27 = arith.constant 0 : i32
      %48 = tpu.memref_slice %arg12[%c5_i32, %c0_i32_27] : memref<16x32xf32, #tpu.memory_space<vmem>> -> memref<1x32xf32, #tpu.memory_space<vmem>>
      %49 = tpu.memref_squeeze %48 : memref<1x32xf32, #tpu.memory_space<vmem>> -> memref<32xf32, #tpu.memory_space<vmem>>
      %50 = tpu.memref_slice %arg15[%c5_i32_25] : memref<16x!tpu.dma_semaphore, #tpu.memory_space<semaphore_mem>> -> memref<1x!tpu.dma_semaphore, #tpu.memory_space<semaphore_mem>>
      %51 = tpu.memref_squeeze %50 : memref<1x!tpu.dma_semaphore, #tpu.memory_space<semaphore_mem>> -> memref<!tpu.dma_semaphore, #tpu.memory_space<semaphore_mem>>
      tpu.enqueue_dma source(%47 : memref<32xf32, #tpu.memory_space<any>>) target(%49 : memref<32xf32, #tpu.memory_space<vmem>>) target_semaphore(%51 : memref<!tpu.dma_semaphore, #tpu.memory_space<semaphore_mem>>)
      %c6 = arith.constant 6 : index
      %52 = memref.load %arg1[%c6] : memref<16xi32, #tpu.memory_space<smem>>
      %c6_i32 = arith.constant 6 : i32
      %c6_i32_28 = arith.constant 6 : i32
      %c0_i32_29 = arith.constant 0 : i32
      %53 = tpu.memref_slice %arg2[%52, %c0_i32_29] : memref<64x32xf32, #tpu.memory_space<any>> -> memref<1x32xf32, #tpu.memory_space<any>>
      %54 = tpu.memref_squeeze %53 : memref<1x32xf32, #tpu.memory_space<any>> -> memref<32xf32, #tpu.memory_space<any>>
      %c0_i32_30 = arith.constant 0 : i32
      %55 = tpu.memref_slice %arg12[%c6_i32, %c0_i32_30] : memref<16x32xf32, #tpu.memory_space<vmem>> -> memref<1x32xf32, #tpu.memory_space<vmem>>
      %56 = tpu.memref_squeeze %55 : memref<1x32xf32, #tpu.memory_space<vmem>> -> memref<32xf32, #tpu.memory_space<vmem>>
      %57 = tpu.memref_slice %arg15[%c6_i32_28] : memref<16x!tpu.dma_semaphore, #tpu.memory_space<semaphore_mem>> -> memref<1x!tpu.dma_semaphore, #tpu.memory_space<semaphore_mem>>
      %58 = tpu.memref_squeeze %57 : memref<1x!tpu.dma_semaphore, #tpu.memory_space<semaphore_mem>> -> memref<!tpu.dma_semaphore, #tpu.memory_space<semaphore_mem>>
      tpu.enqueue_dma source(%54 : memref<32xf32, #tpu.memory_space<any>>) target(%56 : memref<32xf32, #tpu.memory_space<vmem>>) target_semaphore(%58 : memref<!tpu.dma_semaphore, #tpu.memory_space<semaphore_mem>>)
      %c7 = arith.constant 7 : index
      %59 = memref.load %arg1[%c7] : memref<16xi32, #tpu.memory_space<smem>>
      %c7_i32 = arith.constant 7 : i32
      %c7_i32_31 = arith.constant 7 : i32
      %c0_i32_32 = arith.constant 0 : i32
      %60 = tpu.memref_slice %arg2[%59, %c0_i32_32] : memref<64x32xf32, #tpu.memory_space<any>> -> memref<1x32xf32, #tpu.memory_space<any>>
      %61 = tpu.memref_squeeze %60 : memref<1x32xf32, #tpu.memory_space<any>> -> memref<32xf32, #tpu.memory_space<any>>
      %c0_i32_33 = arith.constant 0 : i32
      %62 = tpu.memref_slice %arg12[%c7_i32, %c0_i32_33] : memref<16x32xf32, #tpu.memory_space<vmem>> -> memref<1x32xf32, #tpu.memory_space<vmem>>
      %63 = tpu.memref_squeeze %62 : memref<1x32xf32, #tpu.memory_space<vmem>> -> memref<32xf32, #tpu.memory_space<vmem>>
      %64 = tpu.memref_slice %arg15[%c7_i32_31] : memref<16x!tpu.dma_semaphore, #tpu.memory_space<semaphore_mem>> -> memref<1x!tpu.dma_semaphore, #tpu.memory_space<semaphore_mem>>
      %65 = tpu.memref_squeeze %64 : memref<1x!tpu.dma_semaphore, #tpu.memory_space<semaphore_mem>> -> memref<!tpu.dma_semaphore, #tpu.memory_space<semaphore_mem>>
      tpu.enqueue_dma source(%61 : memref<32xf32, #tpu.memory_space<any>>) target(%63 : memref<32xf32, #tpu.memory_space<vmem>>) target_semaphore(%65 : memref<!tpu.dma_semaphore, #tpu.memory_space<semaphore_mem>>)
      %c8 = arith.constant 8 : index
      %66 = memref.load %arg1[%c8] : memref<16xi32, #tpu.memory_space<smem>>
      %c8_i32 = arith.constant 8 : i32
      %c8_i32_34 = arith.constant 8 : i32
      %c0_i32_35 = arith.constant 0 : i32
      %67 = tpu.memref_slice %arg2[%66, %c0_i32_35] : memref<64x32xf32, #tpu.memory_space<any>> -> memref<1x32xf32, #tpu.memory_space<any>>
      %68 = tpu.memref_squeeze %67 : memref<1x32xf32, #tpu.memory_space<any>> -> memref<32xf32, #tpu.memory_space<any>>
      %c0_i32_36 = arith.constant 0 : i32
      %69 = tpu.memref_slice %arg12[%c8_i32, %c0_i32_36] : memref<16x32xf32, #tpu.memory_space<vmem>> -> memref<1x32xf32, #tpu.memory_space<vmem>>
      %70 = tpu.memref_squeeze %69 : memref<1x32xf32, #tpu.memory_space<vmem>> -> memref<32xf32, #tpu.memory_space<vmem>>
      %71 = tpu.memref_slice %arg15[%c8_i32_34] : memref<16x!tpu.dma_semaphore, #tpu.memory_space<semaphore_mem>> -> memref<1x!tpu.dma_semaphore, #tpu.memory_space<semaphore_mem>>
      %72 = tpu.memref_squeeze %71 : memref<1x!tpu.dma_semaphore, #tpu.memory_space<semaphore_mem>> -> memref<!tpu.dma_semaphore, #tpu.memory_space<semaphore_mem>>
      tpu.enqueue_dma source(%68 : memref<32xf32, #tpu.memory_space<any>>) target(%70 : memref<32xf32, #tpu.memory_space<vmem>>) target_semaphore(%72 : memref<!tpu.dma_semaphore, #tpu.memory_space<semaphore_mem>>)
      %c9 = arith.constant 9 : index
      %73 = memref.load %arg1[%c9] : memref<16xi32, #tpu.memory_space<smem>>
      %c9_i32 = arith.constant 9 : i32
      %c9_i32_37 = arith.constant 9 : i32
      %c0_i32_38 = arith.constant 0 : i32
      %74 = tpu.memref_slice %arg2[%73, %c0_i32_38] : memref<64x32xf32, #tpu.memory_space<any>> -> memref<1x32xf32, #tpu.memory_space<any>>
      %75 = tpu.memref_squeeze %74 : memref<1x32xf32, #tpu.memory_space<any>> -> memref<32xf32, #tpu.memory_space<any>>
      %c0_i32_39 = arith.constant 0 : i32
      %76 = tpu.memref_slice %arg12[%c9_i32, %c0_i32_39] : memref<16x32xf32, #tpu.memory_space<vmem>> -> memref<1x32xf32, #tpu.memory_space<vmem>>
      %77 = tpu.memref_squeeze %76 : memref<1x32xf32, #tpu.memory_space<vmem>> -> memref<32xf32, #tpu.memory_space<vmem>>
      %78 = tpu.memref_slice %arg15[%c9_i32_37] : memref<16x!tpu.dma_semaphore, #tpu.memory_space<semaphore_mem>> -> memref<1x!tpu.dma_semaphore, #tpu.memory_space<semaphore_mem>>
      %79 = tpu.memref_squeeze %78 : memref<1x!tpu.dma_semaphore, #tpu.memory_space<semaphore_mem>> -> memref<!tpu.dma_semaphore, #tpu.memory_space<semaphore_mem>>
      tpu.enqueue_dma source(%75 : memref<32xf32, #tpu.memory_space<any>>) target(%77 : memref<32xf32, #tpu.memory_space<vmem>>) target_semaphore(%79 : memref<!tpu.dma_semaphore, #tpu.memory_space<semaphore_mem>>)
      %c10 = arith.constant 10 : index
      %80 = memref.load %arg1[%c10] : memref<16xi32, #tpu.memory_space<smem>>
      %c10_i32 = arith.constant 10 : i32
      %c10_i32_40 = arith.constant 10 : i32
      %c0_i32_41 = arith.constant 0 : i32
      %81 = tpu.memref_slice %arg2[%80, %c0_i32_41] : memref<64x32xf32, #tpu.memory_space<any>> -> memref<1x32xf32, #tpu.memory_space<any>>
      %82 = tpu.memref_squeeze %81 : memref<1x32xf32, #tpu.memory_space<any>> -> memref<32xf32, #tpu.memory_space<any>>
      %c0_i32_42 = arith.constant 0 : i32
      %83 = tpu.memref_slice %arg12[%c10_i32, %c0_i32_42] : memref<16x32xf32, #tpu.memory_space<vmem>> -> memref<1x32xf32, #tpu.memory_space<vmem>>
      %84 = tpu.memref_squeeze %83 : memref<1x32xf32, #tpu.memory_space<vmem>> -> memref<32xf32, #tpu.memory_space<vmem>>
      %85 = tpu.memref_slice %arg15[%c10_i32_40] : memref<16x!tpu.dma_semaphore, #tpu.memory_space<semaphore_mem>> -> memref<1x!tpu.dma_semaphore, #tpu.memory_space<semaphore_mem>>
      %86 = tpu.memref_squeeze %85 : memref<1x!tpu.dma_semaphore, #tpu.memory_space<semaphore_mem>> -> memref<!tpu.dma_semaphore, #tpu.memory_space<semaphore_mem>>
      tpu.enqueue_dma source(%82 : memref<32xf32, #tpu.memory_space<any>>) target(%84 : memref<32xf32, #tpu.memory_space<vmem>>) target_semaphore(%86 : memref<!tpu.dma_semaphore, #tpu.memory_space<semaphore_mem>>)
      %c11 = arith.constant 11 : index
      %87 = memref.load %arg1[%c11] : memref<16xi32, #tpu.memory_space<smem>>
      %c11_i32 = arith.constant 11 : i32
      %c11_i32_43 = arith.constant 11 : i32
      %c0_i32_44 = arith.constant 0 : i32
      %88 = tpu.memref_slice %arg2[%87, %c0_i32_44] : memref<64x32xf32, #tpu.memory_space<any>> -> memref<1x32xf32, #tpu.memory_space<any>>
      %89 = tpu.memref_squeeze %88 : memref<1x32xf32, #tpu.memory_space<any>> -> memref<32xf32, #tpu.memory_space<any>>
      %c0_i32_45 = arith.constant 0 : i32
      %90 = tpu.memref_slice %arg12[%c11_i32, %c0_i32_45] : memref<16x32xf32, #tpu.memory_space<vmem>> -> memref<1x32xf32, #tpu.memory_space<vmem>>
      %91 = tpu.memref_squeeze %90 : memref<1x32xf32, #tpu.memory_space<vmem>> -> memref<32xf32, #tpu.memory_space<vmem>>
      %92 = tpu.memref_slice %arg15[%c11_i32_43] : memref<16x!tpu.dma_semaphore, #tpu.memory_space<semaphore_mem>> -> memref<1x!tpu.dma_semaphore, #tpu.memory_space<semaphore_mem>>
      %93 = tpu.memref_squeeze %92 : memref<1x!tpu.dma_semaphore, #tpu.memory_space<semaphore_mem>> -> memref<!tpu.dma_semaphore, #tpu.memory_space<semaphore_mem>>
      tpu.enqueue_dma source(%89 : memref<32xf32, #tpu.memory_space<any>>) target(%91 : memref<32xf32, #tpu.memory_space<vmem>>) target_semaphore(%93 : memref<!tpu.dma_semaphore, #tpu.memory_space<semaphore_mem>>)
      %c12 = arith.constant 12 : index
      %94 = memref.load %arg1[%c12] : memref<16xi32, #tpu.memory_space<smem>>
      %c12_i32 = arith.constant 12 : i32
      %c12_i32_46 = arith.constant 12 : i32
      %c0_i32_47 = arith.constant 0 : i32
      %95 = tpu.memref_slice %arg2[%94, %c0_i32_47] : memref<64x32xf32, #tpu.memory_space<any>> -> memref<1x32xf32, #tpu.memory_space<any>>
      %96 = tpu.memref_squeeze %95 : memref<1x32xf32, #tpu.memory_space<any>> -> memref<32xf32, #tpu.memory_space<any>>
      %c0_i32_48 = arith.constant 0 : i32
      %97 = tpu.memref_slice %arg12[%c12_i32, %c0_i32_48] : memref<16x32xf32, #tpu.memory_space<vmem>> -> memref<1x32xf32, #tpu.memory_space<vmem>>
      %98 = tpu.memref_squeeze %97 : memref<1x32xf32, #tpu.memory_space<vmem>> -> memref<32xf32, #tpu.memory_space<vmem>>
      %99 = tpu.memref_slice %arg15[%c12_i32_46] : memref<16x!tpu.dma_semaphore, #tpu.memory_space<semaphore_mem>> -> memref<1x!tpu.dma_semaphore, #tpu.memory_space<semaphore_mem>>
      %100 = tpu.memref_squeeze %99 : memref<1x!tpu.dma_semaphore, #tpu.memory_space<semaphore_mem>> -> memref<!tpu.dma_semaphore, #tpu.memory_space<semaphore_mem>>
      tpu.enqueue_dma source(%96 : memref<32xf32, #tpu.memory_space<any>>) target(%98 : memref<32xf32, #tpu.memory_space<vmem>>) target_semaphore(%100 : memref<!tpu.dma_semaphore, #tpu.memory_space<semaphore_mem>>)
      %c13 = arith.constant 13 : index
      %101 = memref.load %arg1[%c13] : memref<16xi32, #tpu.memory_space<smem>>
      %c13_i32 = arith.constant 13 : i32
      %c13_i32_49 = arith.constant 13 : i32
      %c0_i32_50 = arith.constant 0 : i32
      %102 = tpu.memref_slice %arg2[%101, %c0_i32_50] : memref<64x32xf32, #tpu.memory_space<any>> -> memref<1x32xf32, #tpu.memory_space<any>>
      %103 = tpu.memref_squeeze %102 : memref<1x32xf32, #tpu.memory_space<any>> -> memref<32xf32, #tpu.memory_space<any>>
      %c0_i32_51 = arith.constant 0 : i32
      %104 = tpu.memref_slice %arg12[%c13_i32, %c0_i32_51] : memref<16x32xf32, #tpu.memory_space<vmem>> -> memref<1x32xf32, #tpu.memory_space<vmem>>
      %105 = tpu.memref_squeeze %104 : memref<1x32xf32, #tpu.memory_space<vmem>> -> memref<32xf32, #tpu.memory_space<vmem>>
      %106 = tpu.memref_slice %arg15[%c13_i32_49] : memref<16x!tpu.dma_semaphore, #tpu.memory_space<semaphore_mem>> -> memref<1x!tpu.dma_semaphore, #tpu.memory_space<semaphore_mem>>
      %107 = tpu.memref_squeeze %106 : memref<1x!tpu.dma_semaphore, #tpu.memory_space<semaphore_mem>> -> memref<!tpu.dma_semaphore, #tpu.memory_space<semaphore_mem>>
      tpu.enqueue_dma source(%103 : memref<32xf32, #tpu.memory_space<any>>) target(%105 : memref<32xf32, #tpu.memory_space<vmem>>) target_semaphore(%107 : memref<!tpu.dma_semaphore, #tpu.memory_space<semaphore_mem>>)
      %c14 = arith.constant 14 : index
      %108 = memref.load %arg1[%c14] : memref<16xi32, #tpu.memory_space<smem>>
      %c14_i32 = arith.constant 14 : i32
      %c14_i32_52 = arith.constant 14 : i32
      %c0_i32_53 = arith.constant 0 : i32
      %109 = tpu.memref_slice %arg2[%108, %c0_i32_53] : memref<64x32xf32, #tpu.memory_space<any>> -> memref<1x32xf32, #tpu.memory_space<any>>
      %110 = tpu.memref_squeeze %109 : memref<1x32xf32, #tpu.memory_space<any>> -> memref<32xf32, #tpu.memory_space<any>>
      %c0_i32_54 = arith.constant 0 : i32
      %111 = tpu.memref_slice %arg12[%c14_i32, %c0_i32_54] : memref<16x32xf32, #tpu.memory_space<vmem>> -> memref<1x32xf32, #tpu.memory_space<vmem>>
      %112 = tpu.memref_squeeze %111 : memref<1x32xf32, #tpu.memory_space<vmem>> -> memref<32xf32, #tpu.memory_space<vmem>>
      %113 = tpu.memref_slice %arg15[%c14_i32_52] : memref<16x!tpu.dma_semaphore, #tpu.memory_space<semaphore_mem>> -> memref<1x!tpu.dma_semaphore, #tpu.memory_space<semaphore_mem>>
      %114 = tpu.memref_squeeze %113 : memref<1x!tpu.dma_semaphore, #tpu.memory_space<semaphore_mem>> -> memref<!tpu.dma_semaphore, #tpu.memory_space<semaphore_mem>>
      tpu.enqueue_dma source(%110 : memref<32xf32, #tpu.memory_space<any>>) target(%112 : memref<32xf32, #tpu.memory_space<vmem>>) target_semaphore(%114 : memref<!tpu.dma_semaphore, #tpu.memory_space<semaphore_mem>>)
      %c15 = arith.constant 15 : index
      %115 = memref.load %arg1[%c15] : memref<16xi32, #tpu.memory_space<smem>>
      %c15_i32 = arith.constant 15 : i32
      %c15_i32_55 = arith.constant 15 : i32
      %c0_i32_56 = arith.constant 0 : i32
      %116 = tpu.memref_slice %arg2[%115, %c0_i32_56] : memref<64x32xf32, #tpu.memory_space<any>> -> memref<1x32xf32, #tpu.memory_space<any>>
      %117 = tpu.memref_squeeze %116 : memref<1x32xf32, #tpu.memory_space<any>> -> memref<32xf32, #tpu.memory_space<any>>
      %c0_i32_57 = arith.constant 0 : i32
      %118 = tpu.memref_slice %arg12[%c15_i32, %c0_i32_57] : memref<16x32xf32, #tpu.memory_space<vmem>> -> memref<1x32xf32, #tpu.memory_space<vmem>>
      %119 = tpu.memref_squeeze %118 : memref<1x32xf32, #tpu.memory_space<vmem>> -> memref<32xf32, #tpu.memory_space<vmem>>
      %120 = tpu.memref_slice %arg15[%c15_i32_55] : memref<16x!tpu.dma_semaphore, #tpu.memory_space<semaphore_mem>> -> memref<1x!tpu.dma_semaphore, #tpu.memory_space<semaphore_mem>>
      %121 = tpu.memref_squeeze %120 : memref<1x!tpu.dma_semaphore, #tpu.memory_space<semaphore_mem>> -> memref<!tpu.dma_semaphore, #tpu.memory_space<semaphore_mem>>
      tpu.enqueue_dma source(%117 : memref<32xf32, #tpu.memory_space<any>>) target(%119 : memref<32xf32, #tpu.memory_space<vmem>>) target_semaphore(%121 : memref<!tpu.dma_semaphore, #tpu.memory_space<semaphore_mem>>)
      %cst_58 = arith.constant 0.000000e+00 : bf16
      %122 = vector.broadcast %cst_58 : bf16 to vector<16x64xbf16>
      %c0_59 = arith.constant 0 : index
      %c0_60 = arith.constant 0 : index
      %123 = vector.load %arg13[%c0_59, %c0_60] : memref<16x64xbf16, #tpu.memory_space<vmem>>, vector<16x64xbf16>
      tpu.vector_store %arg13[%c0_59, %c0_60], %122 {strides = array<i32>} : memref<16x64xbf16, #tpu.memory_space<vmem>>, vector<16x64xbf16>,
      %c0_i32_61 = arith.constant 0 : i32
      %c0_i32_62 = arith.constant 0 : i32
      %c0_i32_63 = arith.constant 0 : i32
      %124 = tpu.memref_slice %arg2[%10, %c0_i32_63] : memref<64x32xf32, #tpu.memory_space<any>> -> memref<1x32xf32, #tpu.memory_space<any>>
      %125 = tpu.memref_squeeze %124 : memref<1x32xf32, #tpu.memory_space<any>> -> memref<32xf32, #tpu.memory_space<any>>
      %c0_i32_64 = arith.constant 0 : i32
      %126 = tpu.memref_slice %arg12[%c0_i32_61, %c0_i32_64] : memref<16x32xf32, #tpu.memory_space<vmem>> -> memref<1x32xf32, #tpu.memory_space<vmem>>
      %127 = tpu.memref_squeeze %126 : memref<1x32xf32, #tpu.memory_space<vmem>> -> memref<32xf32, #tpu.memory_space<vmem>>
      %128 = tpu.memref_slice %arg15[%c0_i32_62] : memref<16x!tpu.dma_semaphore, #tpu.memory_space<semaphore_mem>> -> memref<1x!tpu.dma_semaphore, #tpu.memory_space<semaphore_mem>>
      %129 = tpu.memref_squeeze %128 : memref<1x!tpu.dma_semaphore, #tpu.memory_space<semaphore_mem>> -> memref<!tpu.dma_semaphore, #tpu.memory_space<semaphore_mem>>
      tpu.wait_dma2 semaphore(%129 : memref<!tpu.dma_semaphore, #tpu.memory_space<semaphore_mem>>) src(%125 : memref<32xf32, #tpu.memory_space<any>>) dst(%127 : memref<32xf32, #tpu.memory_space<vmem>>)
      %c1_i32_65 = arith.constant 1 : i32
      %c1_i32_66 = arith.constant 1 : i32
      %c0_i32_67 = arith.constant 0 : i32
      %130 = tpu.memref_slice %arg2[%17, %c0_i32_67] : memref<64x32xf32, #tpu.memory_space<any>> -> memref<1x32xf32, #tpu.memory_space<any>>
      %131 = tpu.memref_squeeze %130 : memref<1x32xf32, #tpu.memory_space<any>> -> memref<32xf32, #tpu.memory_space<any>>
      %c0_i32_68 = arith.constant 0 : i32
      %132 = tpu.memref_slice %arg12[%c1_i32_65, %c0_i32_68] : memref<16x32xf32, #tpu.memory_space<vmem>> -> memref<1x32xf32, #tpu.memory_space<vmem>>
      %133 = tpu.memref_squeeze %132 : memref<1x32xf32, #tpu.memory_space<vmem>> -> memref<32xf32, #tpu.memory_space<vmem>>
      %134 = tpu.memref_slice %arg15[%c1_i32_66] : memref<16x!tpu.dma_semaphore, #tpu.memory_space<semaphore_mem>> -> memref<1x!tpu.dma_semaphore, #tpu.memory_space<semaphore_mem>>
      %135 = tpu.memref_squeeze %134 : memref<1x!tpu.dma_semaphore, #tpu.memory_space<semaphore_mem>> -> memref<!tpu.dma_semaphore, #tpu.memory_space<semaphore_mem>>
      tpu.wait_dma2 semaphore(%135 : memref<!tpu.dma_semaphore, #tpu.memory_space<semaphore_mem>>) src(%131 : memref<32xf32, #tpu.memory_space<any>>) dst(%133 : memref<32xf32, #tpu.memory_space<vmem>>)
      %c2_i32_69 = arith.constant 2 : i32
      %c2_i32_70 = arith.constant 2 : i32
      %c0_i32_71 = arith.constant 0 : i32
      %136 = tpu.memref_slice %arg2[%24, %c0_i32_71] : memref<64x32xf32, #tpu.memory_space<any>> -> memref<1x32xf32, #tpu.memory_space<any>>
      %137 = tpu.memref_squeeze %136 : memref<1x32xf32, #tpu.memory_space<any>> -> memref<32xf32, #tpu.memory_space<any>>
      %c0_i32_72 = arith.constant 0 : i32
      %138 = tpu.memref_slice %arg12[%c2_i32_69, %c0_i32_72] : memref<16x32xf32, #tpu.memory_space<vmem>> -> memref<1x32xf32, #tpu.memory_space<vmem>>
      %139 = tpu.memref_squeeze %138 : memref<1x32xf32, #tpu.memory_space<vmem>> -> memref<32xf32, #tpu.memory_space<vmem>>
      %140 = tpu.memref_slice %arg15[%c2_i32_70] : memref<16x!tpu.dma_semaphore, #tpu.memory_space<semaphore_mem>> -> memref<1x!tpu.dma_semaphore, #tpu.memory_space<semaphore_mem>>
      %141 = tpu.memref_squeeze %140 : memref<1x!tpu.dma_semaphore, #tpu.memory_space<semaphore_mem>> -> memref<!tpu.dma_semaphore, #tpu.memory_space<semaphore_mem>>
      tpu.wait_dma2 semaphore(%141 : memref<!tpu.dma_semaphore, #tpu.memory_space<semaphore_mem>>) src(%137 : memref<32xf32, #tpu.memory_space<any>>) dst(%139 : memref<32xf32, #tpu.memory_space<vmem>>)
      %c3_i32_73 = arith.constant 3 : i32
      %c3_i32_74 = arith.constant 3 : i32
      %c0_i32_75 = arith.constant 0 : i32
      %142 = tpu.memref_slice %arg2[%31, %c0_i32_75] : memref<64x32xf32, #tpu.memory_space<any>> -> memref<1x32xf32, #tpu.memory_space<any>>
      %143 = tpu.memref_squeeze %142 : memref<1x32xf32, #tpu.memory_space<any>> -> memref<32xf32, #tpu.memory_space<any>>
      %c0_i32_76 = arith.constant 0 : i32
      %144 = tpu.memref_slice %arg12[%c3_i32_73, %c0_i32_76] : memref<16x32xf32, #tpu.memory_space<vmem>> -> memref<1x32xf32, #tpu.memory_space<vmem>>
      %145 = tpu.memref_squeeze %144 : memref<1x32xf32, #tpu.memory_space<vmem>> -> memref<32xf32, #tpu.memory_space<vmem>>
      %146 = tpu.memref_slice %arg15[%c3_i32_74] : memref<16x!tpu.dma_semaphore, #tpu.memory_space<semaphore_mem>> -> memref<1x!tpu.dma_semaphore, #tpu.memory_space<semaphore_mem>>
      %147 = tpu.memref_squeeze %146 : memref<1x!tpu.dma_semaphore, #tpu.memory_space<semaphore_mem>> -> memref<!tpu.dma_semaphore, #tpu.memory_space<semaphore_mem>>
      tpu.wait_dma2 semaphore(%147 : memref<!tpu.dma_semaphore, #tpu.memory_space<semaphore_mem>>) src(%143 : memref<32xf32, #tpu.memory_space<any>>) dst(%145 : memref<32xf32, #tpu.memory_space<vmem>>)
      %c4_i32_77 = arith.constant 4 : i32
      %c4_i32_78 = arith.constant 4 : i32
      %c0_i32_79 = arith.constant 0 : i32
      %148 = tpu.memref_slice %arg2[%38, %c0_i32_79] : memref<64x32xf32, #tpu.memory_space<any>> -> memref<1x32xf32, #tpu.memory_space<any>>
      %149 = tpu.memref_squeeze %148 : memref<1x32xf32, #tpu.memory_space<any>> -> memref<32xf32, #tpu.memory_space<any>>
      %c0_i32_80 = arith.constant 0 : i32
      %150 = tpu.memref_slice %arg12[%c4_i32_77, %c0_i32_80] : memref<16x32xf32, #tpu.memory_space<vmem>> -> memref<1x32xf32, #tpu.memory_space<vmem>>
      %151 = tpu.memref_squeeze %150 : memref<1x32xf32, #tpu.memory_space<vmem>> -> memref<32xf32, #tpu.memory_space<vmem>>
      %152 = tpu.memref_slice %arg15[%c4_i32_78] : memref<16x!tpu.dma_semaphore, #tpu.memory_space<semaphore_mem>> -> memref<1x!tpu.dma_semaphore, #tpu.memory_space<semaphore_mem>>
      %153 = tpu.memref_squeeze %152 : memref<1x!tpu.dma_semaphore, #tpu.memory_space<semaphore_mem>> -> memref<!tpu.dma_semaphore, #tpu.memory_space<semaphore_mem>>
      tpu.wait_dma2 semaphore(%153 : memref<!tpu.dma_semaphore, #tpu.memory_space<semaphore_mem>>) src(%149 : memref<32xf32, #tpu.memory_space<any>>) dst(%151 : memref<32xf32, #tpu.memory_space<vmem>>)
      %c5_i32_81 = arith.constant 5 : i32
      %c5_i32_82 = arith.constant 5 : i32
      %c0_i32_83 = arith.constant 0 : i32
      %154 = tpu.memref_slice %arg2[%45, %c0_i32_83] : memref<64x32xf32, #tpu.memory_space<any>> -> memref<1x32xf32, #tpu.memory_space<any>>
      %155 = tpu.memref_squeeze %154 : memref<1x32xf32, #tpu.memory_space<any>> -> memref<32xf32, #tpu.memory_space<any>>
      %c0_i32_84 = arith.constant 0 : i32
      %156 = tpu.memref_slice %arg12[%c5_i32_81, %c0_i32_84] : memref<16x32xf32, #tpu.memory_space<vmem>> -> memref<1x32xf32, #tpu.memory_space<vmem>>
      %157 = tpu.memref_squeeze %156 : memref<1x32xf32, #tpu.memory_space<vmem>> -> memref<32xf32, #tpu.memory_space<vmem>>
      %158 = tpu.memref_slice %arg15[%c5_i32_82] : memref<16x!tpu.dma_semaphore, #tpu.memory_space<semaphore_mem>> -> memref<1x!tpu.dma_semaphore, #tpu.memory_space<semaphore_mem>>
      %159 = tpu.memref_squeeze %158 : memref<1x!tpu.dma_semaphore, #tpu.memory_space<semaphore_mem>> -> memref<!tpu.dma_semaphore, #tpu.memory_space<semaphore_mem>>
      tpu.wait_dma2 semaphore(%159 : memref<!tpu.dma_semaphore, #tpu.memory_space<semaphore_mem>>) src(%155 : memref<32xf32, #tpu.memory_space<any>>) dst(%157 : memref<32xf32, #tpu.memory_space<vmem>>)
      %c6_i32_85 = arith.constant 6 : i32
      %c6_i32_86 = arith.constant 6 : i32
      %c0_i32_87 = arith.constant 0 : i32
      %160 = tpu.memref_slice %arg2[%52, %c0_i32_87] : memref<64x32xf32, #tpu.memory_space<any>> -> memref<1x32xf32, #tpu.memory_space<any>>
      %161 = tpu.memref_squeeze %160 : memref<1x32xf32, #tpu.memory_space<any>> -> memref<32xf32, #tpu.memory_space<any>>
      %c0_i32_88 = arith.constant 0 : i32
      %162 = tpu.memref_slice %arg12[%c6_i32_85, %c0_i32_88] : memref<16x32xf32, #tpu.memory_space<vmem>> -> memref<1x32xf32, #tpu.memory_space<vmem>>
      %163 = tpu.memref_squeeze %162 : memref<1x32xf32, #tpu.memory_space<vmem>> -> memref<32xf32, #tpu.memory_space<vmem>>
      %164 = tpu.memref_slice %arg15[%c6_i32_86] : memref<16x!tpu.dma_semaphore, #tpu.memory_space<semaphore_mem>> -> memref<1x!tpu.dma_semaphore, #tpu.memory_space<semaphore_mem>>
      %165 = tpu.memref_squeeze %164 : memref<1x!tpu.dma_semaphore, #tpu.memory_space<semaphore_mem>> -> memref<!tpu.dma_semaphore, #tpu.memory_space<semaphore_mem>>
      tpu.wait_dma2 semaphore(%165 : memref<!tpu.dma_semaphore, #tpu.memory_space<semaphore_mem>>) src(%161 : memref<32xf32, #tpu.memory_space<any>>) dst(%163 : memref<32xf32, #tpu.memory_space<vmem>>)
      %c7_i32_89 = arith.constant 7 : i32
      %c7_i32_90 = arith.constant 7 : i32
      %c0_i32_91 = arith.constant 0 : i32
      %166 = tpu.memref_slice %arg2[%59, %c0_i32_91] : memref<64x32xf32, #tpu.memory_space<any>> -> memref<1x32xf32, #tpu.memory_space<any>>
      %167 = tpu.memref_squeeze %166 : memref<1x32xf32, #tpu.memory_space<any>> -> memref<32xf32, #tpu.memory_space<any>>
      %c0_i32_92 = arith.constant 0 : i32
      %168 = tpu.memref_slice %arg12[%c7_i32_89, %c0_i32_92] : memref<16x32xf32, #tpu.memory_space<vmem>> -> memref<1x32xf32, #tpu.memory_space<vmem>>
      %169 = tpu.memref_squeeze %168 : memref<1x32xf32, #tpu.memory_space<vmem>> -> memref<32xf32, #tpu.memory_space<vmem>>
      %170 = tpu.memref_slice %arg15[%c7_i32_90] : memref<16x!tpu.dma_semaphore, #tpu.memory_space<semaphore_mem>> -> memref<1x!tpu.dma_semaphore, #tpu.memory_space<semaphore_mem>>
      %171 = tpu.memref_squeeze %170 : memref<1x!tpu.dma_semaphore, #tpu.memory_space<semaphore_mem>> -> memref<!tpu.dma_semaphore, #tpu.memory_space<semaphore_mem>>
      tpu.wait_dma2 semaphore(%171 : memref<!tpu.dma_semaphore, #tpu.memory_space<semaphore_mem>>) src(%167 : memref<32xf32, #tpu.memory_space<any>>) dst(%169 : memref<32xf32, #tpu.memory_space<vmem>>)
      %c8_i32_93 = arith.constant 8 : i32
      %c8_i32_94 = arith.constant 8 : i32
      %c0_i32_95 = arith.constant 0 : i32
      %172 = tpu.memref_slice %arg2[%66, %c0_i32_95] : memref<64x32xf32, #tpu.memory_space<any>> -> memref<1x32xf32, #tpu.memory_space<any>>
      %173 = tpu.memref_squeeze %172 : memref<1x32xf32, #tpu.memory_space<any>> -> memref<32xf32, #tpu.memory_space<any>>
      %c0_i32_96 = arith.constant 0 : i32
      %174 = tpu.memref_slice %arg12[%c8_i32_93, %c0_i32_96] : memref<16x32xf32, #tpu.memory_space<vmem>> -> memref<1x32xf32, #tpu.memory_space<vmem>>
      %175 = tpu.memref_squeeze %174 : memref<1x32xf32, #tpu.memory_space<vmem>> -> memref<32xf32, #tpu.memory_space<vmem>>
      %176 = tpu.memref_slice %arg15[%c8_i32_94] : memref<16x!tpu.dma_semaphore, #tpu.memory_space<semaphore_mem>> -> memref<1x!tpu.dma_semaphore, #tpu.memory_space<semaphore_mem>>
      %177 = tpu.memref_squeeze %176 : memref<1x!tpu.dma_semaphore, #tpu.memory_space<semaphore_mem>> -> memref<!tpu.dma_semaphore, #tpu.memory_space<semaphore_mem>>
      tpu.wait_dma2 semaphore(%177 : memref<!tpu.dma_semaphore, #tpu.memory_space<semaphore_mem>>) src(%173 : memref<32xf32, #tpu.memory_space<any>>) dst(%175 : memref<32xf32, #tpu.memory_space<vmem>>)
      %c9_i32_97 = arith.constant 9 : i32
      %c9_i32_98 = arith.constant 9 : i32
      %c0_i32_99 = arith.constant 0 : i32
      %178 = tpu.memref_slice %arg2[%73, %c0_i32_99] : memref<64x32xf32, #tpu.memory_space<any>> -> memref<1x32xf32, #tpu.memory_space<any>>
      %179 = tpu.memref_squeeze %178 : memref<1x32xf32, #tpu.memory_space<any>> -> memref<32xf32, #tpu.memory_space<any>>
      %c0_i32_100 = arith.constant 0 : i32
      %180 = tpu.memref_slice %arg12[%c9_i32_97, %c0_i32_100] : memref<16x32xf32, #tpu.memory_space<vmem>> -> memref<1x32xf32, #tpu.memory_space<vmem>>
      %181 = tpu.memref_squeeze %180 : memref<1x32xf32, #tpu.memory_space<vmem>> -> memref<32xf32, #tpu.memory_space<vmem>>
      %182 = tpu.memref_slice %arg15[%c9_i32_98] : memref<16x!tpu.dma_semaphore, #tpu.memory_space<semaphore_mem>> -> memref<1x!tpu.dma_semaphore, #tpu.memory_space<semaphore_mem>>
      %183 = tpu.memref_squeeze %182 : memref<1x!tpu.dma_semaphore, #tpu.memory_space<semaphore_mem>> -> memref<!tpu.dma_semaphore, #tpu.memory_space<semaphore_mem>>
      tpu.wait_dma2 semaphore(%183 : memref<!tpu.dma_semaphore, #tpu.memory_space<semaphore_mem>>) src(%179 : memref<32xf32, #tpu.memory_space<any>>) dst(%181 : memref<32xf32, #tpu.memory_space<vmem>>)
      %c10_i32_101 = arith.constant 10 : i32
      %c10_i32_102 = arith.constant 10 : i32
      %c0_i32_103 = arith.constant 0 : i32
      %184 = tpu.memref_slice %arg2[%80, %c0_i32_103] : memref<64x32xf32, #tpu.memory_space<any>> -> memref<1x32xf32, #tpu.memory_space<any>>
      %185 = tpu.memref_squeeze %184 : memref<1x32xf32, #tpu.memory_space<any>> -> memref<32xf32, #tpu.memory_space<any>>
      %c0_i32_104 = arith.constant 0 : i32
      %186 = tpu.memref_slice %arg12[%c10_i32_101, %c0_i32_104] : memref<16x32xf32, #tpu.memory_space<vmem>> -> memref<1x32xf32, #tpu.memory_space<vmem>>
      %187 = tpu.memref_squeeze %186 : memref<1x32xf32, #tpu.memory_space<vmem>> -> memref<32xf32, #tpu.memory_space<vmem>>
      %188 = tpu.memref_slice %arg15[%c10_i32_102] : memref<16x!tpu.dma_semaphore, #tpu.memory_space<semaphore_mem>> -> memref<1x!tpu.dma_semaphore, #tpu.memory_space<semaphore_mem>>
      %189 = tpu.memref_squeeze %188 : memref<1x!tpu.dma_semaphore, #tpu.memory_space<semaphore_mem>> -> memref<!tpu.dma_semaphore, #tpu.memory_space<semaphore_mem>>
      tpu.wait_dma2 semaphore(%189 : memref<!tpu.dma_semaphore, #tpu.memory_space<semaphore_mem>>) src(%185 : memref<32xf32, #tpu.memory_space<any>>) dst(%187 : memref<32xf32, #tpu.memory_space<vmem>>)
      %c11_i32_105 = arith.constant 11 : i32
      %c11_i32_106 = arith.constant 11 : i32
      %c0_i32_107 = arith.constant 0 : i32
      %190 = tpu.memref_slice %arg2[%87, %c0_i32_107] : memref<64x32xf32, #tpu.memory_space<any>> -> memref<1x32xf32, #tpu.memory_space<any>>
      %191 = tpu.memref_squeeze %190 : memref<1x32xf32, #tpu.memory_space<any>> -> memref<32xf32, #tpu.memory_space<any>>
      %c0_i32_108 = arith.constant 0 : i32
      %192 = tpu.memref_slice %arg12[%c11_i32_105, %c0_i32_108] : memref<16x32xf32, #tpu.memory_space<vmem>> -> memref<1x32xf32, #tpu.memory_space<vmem>>
      %193 = tpu.memref_squeeze %192 : memref<1x32xf32, #tpu.memory_space<vmem>> -> memref<32xf32, #tpu.memory_space<vmem>>
      %194 = tpu.memref_slice %arg15[%c11_i32_106] : memref<16x!tpu.dma_semaphore, #tpu.memory_space<semaphore_mem>> -> memref<1x!tpu.dma_semaphore, #tpu.memory_space<semaphore_mem>>
      %195 = tpu.memref_squeeze %194 : memref<1x!tpu.dma_semaphore, #tpu.memory_space<semaphore_mem>> -> memref<!tpu.dma_semaphore, #tpu.memory_space<semaphore_mem>>
      tpu.wait_dma2 semaphore(%195 : memref<!tpu.dma_semaphore, #tpu.memory_space<semaphore_mem>>) src(%191 : memref<32xf32, #tpu.memory_space<any>>) dst(%193 : memref<32xf32, #tpu.memory_space<vmem>>)
      %c12_i32_109 = arith.constant 12 : i32
      %c12_i32_110 = arith.constant 12 : i32
      %c0_i32_111 = arith.constant 0 : i32
      %196 = tpu.memref_slice %arg2[%94, %c0_i32_111] : memref<64x32xf32, #tpu.memory_space<any>> -> memref<1x32xf32, #tpu.memory_space<any>>
      %197 = tpu.memref_squeeze %196 : memref<1x32xf32, #tpu.memory_space<any>> -> memref<32xf32, #tpu.memory_space<any>>
      %c0_i32_112 = arith.constant 0 : i32
      %198 = tpu.memref_slice %arg12[%c12_i32_109, %c0_i32_112] : memref<16x32xf32, #tpu.memory_space<vmem>> -> memref<1x32xf32, #tpu.memory_space<vmem>>
      %199 = tpu.memref_squeeze %198 : memref<1x32xf32, #tpu.memory_space<vmem>> -> memref<32xf32, #tpu.memory_space<vmem>>
      %200 = tpu.memref_slice %arg15[%c12_i32_110] : memref<16x!tpu.dma_semaphore, #tpu.memory_space<semaphore_mem>> -> memref<1x!tpu.dma_semaphore, #tpu.memory_space<semaphore_mem>>
      %201 = tpu.memref_squeeze %200 : memref<1x!tpu.dma_semaphore, #tpu.memory_space<semaphore_mem>> -> memref<!tpu.dma_semaphore, #tpu.memory_space<semaphore_mem>>
      tpu.wait_dma2 semaphore(%201 : memref<!tpu.dma_semaphore, #tpu.memory_space<semaphore_mem>>) src(%197 : memref<32xf32, #tpu.memory_space<any>>) dst(%199 : memref<32xf32, #tpu.memory_space<vmem>>)
      %c13_i32_113 = arith.constant 13 : i32
      %c13_i32_114 = arith.constant 13 : i32
      %c0_i32_115 = arith.constant 0 : i32
      %202 = tpu.memref_slice %arg2[%101, %c0_i32_115] : memref<64x32xf32, #tpu.memory_space<any>> -> memref<1x32xf32, #tpu.memory_space<any>>
      %203 = tpu.memref_squeeze %202 : memref<1x32xf32, #tpu.memory_space<any>> -> memref<32xf32, #tpu.memory_space<any>>
      %c0_i32_116 = arith.constant 0 : i32
      %204 = tpu.memref_slice %arg12[%c13_i32_113, %c0_i32_116] : memref<16x32xf32, #tpu.memory_space<vmem>> -> memref<1x32xf32, #tpu.memory_space<vmem>>
      %205 = tpu.memref_squeeze %204 : memref<1x32xf32, #tpu.memory_space<vmem>> -> memref<32xf32, #tpu.memory_space<vmem>>
      %206 = tpu.memref_slice %arg15[%c13_i32_114] : memref<16x!tpu.dma_semaphore, #tpu.memory_space<semaphore_mem>> -> memref<1x!tpu.dma_semaphore, #tpu.memory_space<semaphore_mem>>
      %207 = tpu.memref_squeeze %206 : memref<1x!tpu.dma_semaphore, #tpu.memory_space<semaphore_mem>> -> memref<!tpu.dma_semaphore, #tpu.memory_space<semaphore_mem>>
      tpu.wait_dma2 semaphore(%207 : memref<!tpu.dma_semaphore, #tpu.memory_space<semaphore_mem>>) src(%203 : memref<32xf32, #tpu.memory_space<any>>) dst(%205 : memref<32xf32, #tpu.memory_space<vmem>>)
      %c14_i32_117 = arith.constant 14 : i32
      %c14_i32_118 = arith.constant 14 : i32
      %c0_i32_119 = arith.constant 0 : i32
      %208 = tpu.memref_slice %arg2[%108, %c0_i32_119] : memref<64x32xf32, #tpu.memory_space<any>> -> memref<1x32xf32, #tpu.memory_space<any>>
      %209 = tpu.memref_squeeze %208 : memref<1x32xf32, #tpu.memory_space<any>> -> memref<32xf32, #tpu.memory_space<any>>
      %c0_i32_120 = arith.constant 0 : i32
      %210 = tpu.memref_slice %arg12[%c14_i32_117, %c0_i32_120] : memref<16x32xf32, #tpu.memory_space<vmem>> -> memref<1x32xf32, #tpu.memory_space<vmem>>
      %211 = tpu.memref_squeeze %210 : memref<1x32xf32, #tpu.memory_space<vmem>> -> memref<32xf32, #tpu.memory_space<vmem>>
      %212 = tpu.memref_slice %arg15[%c14_i32_118] : memref<16x!tpu.dma_semaphore, #tpu.memory_space<semaphore_mem>> -> memref<1x!tpu.dma_semaphore, #tpu.memory_space<semaphore_mem>>
      %213 = tpu.memref_squeeze %212 : memref<1x!tpu.dma_semaphore, #tpu.memory_space<semaphore_mem>> -> memref<!tpu.dma_semaphore, #tpu.memory_space<semaphore_mem>>
      tpu.wait_dma2 semaphore(%213 : memref<!tpu.dma_semaphore, #tpu.memory_space<semaphore_mem>>) src(%209 : memref<32xf32, #tpu.memory_space<any>>) dst(%211 : memref<32xf32, #tpu.memory_space<vmem>>)
      %c15_i32_121 = arith.constant 15 : i32
      %c15_i32_122 = arith.constant 15 : i32
      %c0_i32_123 = arith.constant 0 : i32
      %214 = tpu.memref_slice %arg2[%115, %c0_i32_123] : memref<64x32xf32, #tpu.memory_space<any>> -> memref<1x32xf32, #tpu.memory_space<any>>
      %215 = tpu.memref_squeeze %214 : memref<1x32xf32, #tpu.memory_space<any>> -> memref<32xf32, #tpu.memory_space<any>>
      %c0_i32_124 = arith.constant 0 : i32
      %216 = tpu.memref_slice %arg12[%c15_i32_121, %c0_i32_124] : memref<16x32xf32, #tpu.memory_space<vmem>> -> memref<1x32xf32, #tpu.memory_space<vmem>>
      %217 = tpu.memref_squeeze %216 : memref<1x32xf32, #tpu.memory_space<vmem>> -> memref<32xf32, #tpu.memory_space<vmem>>
      %218 = tpu.memref_slice %arg15[%c15_i32_122] : memref<16x!tpu.dma_semaphore, #tpu.memory_space<semaphore_mem>> -> memref<1x!tpu.dma_semaphore, #tpu.memory_space<semaphore_mem>>
      %219 = tpu.memref_squeeze %218 : memref<1x!tpu.dma_semaphore, #tpu.memory_space<semaphore_mem>> -> memref<!tpu.dma_semaphore, #tpu.memory_space<semaphore_mem>>
      tpu.wait_dma2 semaphore(%219 : memref<!tpu.dma_semaphore, #tpu.memory_space<semaphore_mem>>) src(%215 : memref<32xf32, #tpu.memory_space<any>>) dst(%217 : memref<32xf32, #tpu.memory_space<vmem>>)
      %c0_125 = arith.constant 0 : index
      %c0_126 = arith.constant 0 : index
      %220 = vector.load %arg12[%c0_125, %c0_126] : memref<16x32xf32, #tpu.memory_space<vmem>>, vector<16x32xf32>
      %221 = arith.truncf %220 : vector<16x32xf32> to vector<16x32xbf16>
      %c0_127 = arith.constant 0 : index
      %c0_128 = arith.constant 0 : index
      %222 = vector.load %arg13[%c0_127, %c0_128] : memref<16x64xbf16, #tpu.memory_space<vmem>>, vector<16x32xbf16>
      tpu.vector_store %arg13[%c0_127, %c0_128], %221 {strides = array<i32>} : memref<16x64xbf16, #tpu.memory_space<vmem>>, vector<16x32xbf16>,
      %c0_129 = arith.constant 0 : index
      %c0_130 = arith.constant 0 : index
      %c0_131 = arith.constant 0 : index
      %223 = vector.load %arg7[%c0_129, %c0_130, %c0_131] : memref<2x16x32xf32, #tpu.memory_space<vmem>>, vector<1x16x32xf32>
      %224 = vector.shape_cast %223 : vector<1x16x32xf32> to vector<16x32xf32>
      %c0_132 = arith.constant 0 : index
      %c0_133 = arith.constant 0 : index
      %c0_134 = arith.constant 0 : index
      %225 = vector.load %arg8[%c0_132, %c0_133, %c0_134] : memref<2x16x32xf32, #tpu.memory_space<vmem>>, vector<1x16x32xf32>
      %226 = vector.shape_cast %225 : vector<1x16x32xf32> to vector<16x32xf32>
      %227 = arith.truncf %224 : vector<16x32xf32> to vector<16x32xbf16>
      %c0_135 = arith.constant 0 : index
      %c32 = arith.constant 32 : index
      %228 = vector.load %arg13[%c0_135, %c32] : memref<16x64xbf16, #tpu.memory_space<vmem>>, vector<16x32xbf16>
      tpu.vector_store %arg13[%c0_135, %c32], %227 {strides = array<i32>} : memref<16x64xbf16, #tpu.memory_space<vmem>>, vector<16x32xbf16>,
      %c0_136 = arith.constant 0 : index
      %c0_137 = arith.constant 0 : index
      %229 = vector.load %arg13[%c0_136, %c0_137] : memref<16x64xbf16, #tpu.memory_space<vmem>>, vector<16x64xbf16>
      %c0_138 = arith.constant 0 : index
      %c0_139 = arith.constant 0 : index
      %c0_140 = arith.constant 0 : index
      %230 = vector.load %arg3[%c0_138, %c0_139, %c0_140] : memref<2x64x128xbf16, #tpu.memory_space<vmem>>, vector<1x64x128xbf16>
      %231 = vector.shape_cast %230 : vector<1x64x128xbf16> to vector<64x128xbf16>
      %cst_141 = arith.constant dense<0.000000e+00> : vector<16x128xf32>
      %232 = tpu.matmul %229, %231, %cst_141 {dimension_numbers = #tpu.dot_dimension_numbers<[1], [0], [0], [1], [0, 0, 1, 1], [], []>} : vector<16x64xbf16>, vector<64x128xbf16>, vector<16x128xf32> -> vector<16x128xf32>
      %c0_142 = arith.constant 0 : index
      %c0_143 = arith.constant 0 : index
      %c0_144 = arith.constant 0 : index
      %233 = vector.load %arg4[%c0_142, %c0_143, %c0_144] : memref<2x1x128xf32, #tpu.memory_space<vmem>>, vector<1x1x128xf32>
      %234 = vector.shape_cast %233 : vector<1x1x128xf32> to vector<1x128xf32>
      %235 = vector.broadcast %234 : vector<1x128xf32> to vector<16x128xf32>
      %236 = arith.addf %232, %235 : vector<16x128xf32>
      %237 = vector.extract_strided_slice %236 {offsets = [0, 0], sizes = [16, 96], strides = [1, 1]} : vector<16x128xf32> to vector<16x96xf32>
      %238 = arith.negf %237 : vector<16x96xf32>
      %239 = math.exp %238 : vector<16x96xf32>
      %cst_145 = arith.constant 1.000000e+00 : f32
      %240 = vector.broadcast %cst_145 : f32 to vector<16x96xf32>
      %241 = arith.addf %240, %239 : vector<16x96xf32>
      %242 = arith.divf %240, %241 : vector<16x96xf32>
      %243 = vector.extract_strided_slice %236 {offsets = [0, 96], sizes = [16, 32], strides = [1, 1]} : vector<16x128xf32> to vector<16x32xf32>
      %244 = math.tanh %243 : vector<16x32xf32>
      %245 = vector.extract_strided_slice %242 {offsets = [0, 0], sizes = [16, 32], strides = [1, 1]} : vector<16x96xf32> to vector<16x32xf32>
      %246 = vector.extract_strided_slice %242 {offsets = [0, 32], sizes = [16, 32], strides = [1, 1]} : vector<16x96xf32> to vector<16x32xf32>
      %247 = vector.extract_strided_slice %242 {offsets = [0, 64], sizes = [16, 32], strides = [1, 1]} : vector<16x96xf32> to vector<16x32xf32>
      %248 = arith.mulf %246, %226 : vector<16x32xf32>
      %249 = arith.mulf %245, %244 : vector<16x32xf32>
      %250 = arith.addf %248, %249 : vector<16x32xf32>
      %251 = math.tanh %250 : vector<16x32xf32>
      %252 = arith.mulf %247, %251 : vector<16x32xf32>
      %c0_146 = arith.constant 0 : index
      %c0_147 = arith.constant 0 : index
      %c0_148 = arith.constant 0 : index
      %253 = vector.load %arg10[%c0_146, %c0_147, %c0_148] : memref<2x16x32xf32, #tpu.memory_space<vmem>>, vector<1x16x32xf32>
      %254 = vector.shape_cast %253 : vector<1x16x32xf32> to vector<16x32xf32>
      %255 = vector.shape_cast %252 : vector<16x32xf32> to vector<1x16x32xf32>
      tpu.vector_store %arg10[%c0_146, %c0_147, %c0_148], %255 {strides = array<i32>} : memref<2x16x32xf32, #tpu.memory_space<vmem>>, vector<1x16x32xf32>,
      %c0_149 = arith.constant 0 : index
      %c0_150 = arith.constant 0 : index
      %c0_151 = arith.constant 0 : index
      %256 = vector.load %arg11[%c0_149, %c0_150, %c0_151] : memref<2x16x32xf32, #tpu.memory_space<vmem>>, vector<1x16x32xf32>
      %257 = vector.shape_cast %256 : vector<1x16x32xf32> to vector<16x32xf32>
      %258 = vector.shape_cast %250 : vector<16x32xf32> to vector<1x16x32xf32>
      tpu.vector_store %arg11[%c0_149, %c0_150, %c0_151], %258 {strides = array<i32>} : memref<2x16x32xf32, #tpu.memory_space<vmem>>, vector<1x16x32xf32>,
      %259 = arith.truncf %252 : vector<16x32xf32> to vector<16x32xbf16>
      %c0_152 = arith.constant 0 : index
      %c0_153 = arith.constant 0 : index
      %260 = vector.load %arg13[%c0_152, %c0_153] : memref<16x64xbf16, #tpu.memory_space<vmem>>, vector<16x32xbf16>
      tpu.vector_store %arg13[%c0_152, %c0_153], %259 {strides = array<i32>} : memref<16x64xbf16, #tpu.memory_space<vmem>>, vector<16x32xbf16>,
      %c1_154 = arith.constant 1 : index
      %c0_155 = arith.constant 0 : index
      %c0_156 = arith.constant 0 : index
      %261 = vector.load %arg7[%c1_154, %c0_155, %c0_156] : memref<2x16x32xf32, #tpu.memory_space<vmem>>, vector<1x16x32xf32>
      %262 = vector.shape_cast %261 : vector<1x16x32xf32> to vector<16x32xf32>
      %c1_157 = arith.constant 1 : index
      %c0_158 = arith.constant 0 : index
      %c0_159 = arith.constant 0 : index
      %263 = vector.load %arg8[%c1_157, %c0_158, %c0_159] : memref<2x16x32xf32, #tpu.memory_space<vmem>>, vector<1x16x32xf32>
      %264 = vector.shape_cast %263 : vector<1x16x32xf32> to vector<16x32xf32>
      %265 = arith.truncf %262 : vector<16x32xf32> to vector<16x32xbf16>
      %c0_160 = arith.constant 0 : index
      %c32_161 = arith.constant 32 : index
      %266 = vector.load %arg13[%c0_160, %c32_161] : memref<16x64xbf16, #tpu.memory_space<vmem>>, vector<16x32xbf16>
      tpu.vector_store %arg13[%c0_160, %c32_161], %265 {strides = array<i32>} : memref<16x64xbf16, #tpu.memory_space<vmem>>, vector<16x32xbf16>,
      %c0_162 = arith.constant 0 : index
      %c0_163 = arith.constant 0 : index
      %267 = vector.load %arg13[%c0_162, %c0_163] : memref<16x64xbf16, #tpu.memory_space<vmem>>, vector<16x64xbf16>
      %c1_164 = arith.constant 1 : index
      %c0_165 = arith.constant 0 : index
      %c0_166 = arith.constant 0 : index
      %268 = vector.load %arg3[%c1_164, %c0_165, %c0_166] : memref<2x64x128xbf16, #tpu.memory_space<vmem>>, vector<1x64x128xbf16>
      %269 = vector.shape_cast %268 : vector<1x64x128xbf16> to vector<64x128xbf16>
      %cst_167 = arith.constant dense<0.000000e+00> : vector<16x128xf32>
      %270 = tpu.matmul %267, %269, %cst_167 {dimension_numbers = #tpu.dot_dimension_numbers<[1], [0], [0], [1], [0, 0, 1, 1], [], []>} : vector<16x64xbf16>, vector<64x128xbf16>, vector<16x128xf32> -> vector<16x128xf32>
      %c1_168 = arith.constant 1 : index
      %c0_169 = arith.constant 0 : index
      %c0_170 = arith.constant 0 : index
      %271 = vector.load %arg4[%c1_168, %c0_169, %c0_170] : memref<2x1x128xf32, #tpu.memory_space<vmem>>, vector<1x1x128xf32>
      %272 = vector.shape_cast %271 : vector<1x1x128xf32> to vector<1x128xf32>
      %273 = vector.broadcast %272 : vector<1x128xf32> to vector<16x128xf32>
      %274 = arith.addf %270, %273 : vector<16x128xf32>
      %275 = vector.extract_strided_slice %274 {offsets = [0, 0], sizes = [16, 96], strides = [1, 1]} : vector<16x128xf32> to vector<16x96xf32>
      %276 = arith.negf %275 : vector<16x96xf32>
      %277 = math.exp %276 : vector<16x96xf32>
      %cst_171 = arith.constant 1.000000e+00 : f32
      %278 = vector.broadcast %cst_171 : f32 to vector<16x96xf32>
      %279 = arith.addf %278, %277 : vector<16x96xf32>
      %280 = arith.divf %278, %279 : vector<16x96xf32>
      %281 = vector.extract_strided_slice %274 {offsets = [0, 96], sizes = [16, 32], strides = [1, 1]} : vector<16x128xf32> to vector<16x32xf32>
      %282 = math.tanh %281 : vector<16x32xf32>
      %283 = vector.extract_strided_slice %280 {offsets = [0, 0], sizes = [16, 32], strides = [1, 1]} : vector<16x96xf32> to vector<16x32xf32>
      %284 = vector.extract_strided_slice %280 {offsets = [0, 32], sizes = [16, 32], strides = [1, 1]} : vector<16x96xf32> to vector<16x32xf32>
      %285 = vector.extract_strided_slice %280 {offsets = [0, 64], sizes = [16, 32], strides = [1, 1]} : vector<16x96xf32> to vector<16x32xf32>
      %286 = arith.mulf %284, %264 : vector<16x32xf32>
      %287 = arith.mulf %283, %282 : vector<16x32xf32>
      %288 = arith.addf %286, %287 : vector<16x32xf32>
      %289 = math.tanh %288 : vector<16x32xf32>
      %290 = arith.mulf %285, %289 : vector<16x32xf32>
      %c1_172 = arith.constant 1 : index
      %c0_173 = arith.constant 0 : index
      %c0_174 = arith.constant 0 : index
      %291 = vector.load %arg10[%c1_172, %c0_173, %c0_174] : memref<2x16x32xf32, #tpu.memory_space<vmem>>, vector<1x16x32xf32>
      %292 = vector.shape_cast %291 : vector<1x16x32xf32> to vector<16x32xf32>
      %293 = vector.shape_cast %290 : vector<16x32xf32> to vector<1x16x32xf32>
      tpu.vector_store %arg10[%c1_172, %c0_173, %c0_174], %293 {strides = array<i32>} : memref<2x16x32xf32, #tpu.memory_space<vmem>>, vector<1x16x32xf32>,
      %c1_175 = arith.constant 1 : index
      %c0_176 = arith.constant 0 : index
      %c0_177 = arith.constant 0 : index
      %294 = vector.load %arg11[%c1_175, %c0_176, %c0_177] : memref<2x16x32xf32, #tpu.memory_space<vmem>>, vector<1x16x32xf32>
      %295 = vector.shape_cast %294 : vector<1x16x32xf32> to vector<16x32xf32>
      %296 = vector.shape_cast %288 : vector<16x32xf32> to vector<1x16x32xf32>
      tpu.vector_store %arg11[%c1_175, %c0_176, %c0_177], %296 {strides = array<i32>} : memref<2x16x32xf32, #tpu.memory_space<vmem>>, vector<1x16x32xf32>,
      %297 = arith.truncf %290 : vector<16x32xf32> to vector<16x32xbf16>
      %c0_178 = arith.constant 0 : index
      %c0_179 = arith.constant 0 : index
      %298 = vector.load %arg14[%c0_178, %c0_179] : memref<16x32xbf16, #tpu.memory_space<vmem>>, vector<16x32xbf16>
      tpu.vector_store %arg14[%c0_178, %c0_179], %297 {strides = array<i32>} : memref<16x32xbf16, #tpu.memory_space<vmem>>, vector<16x32xbf16>,
    } else {
    }
    %c0 = arith.constant 0 : index
    %c0_1 = arith.constant 0 : index
    %3 = vector.load %arg14[%c0, %c0_1] : memref<16x32xbf16, #tpu.memory_space<vmem>>, vector<16x32xbf16>
    %c0_2 = arith.constant 0 : index
    %c0_3 = arith.constant 0 : index
    %4 = vector.load %arg5[%c0_2, %c0_3] : memref<32x128xbf16, #tpu.memory_space<vmem>>, vector<32x128xbf16>
    %cst = arith.constant dense<0.000000e+00> : vector<16x128xf32>
    %5 = tpu.matmul %3, %4, %cst {dimension_numbers = #tpu.dot_dimension_numbers<[1], [0], [0], [1], [0, 0, 1, 1], [], []>} : vector<16x32xbf16>, vector<32x128xbf16>, vector<16x128xf32> -> vector<16x128xf32>
    %c0_4 = arith.constant 0 : index
    %c0_5 = arith.constant 0 : index
    %6 = vector.load %arg6[%c0_4, %c0_5] : memref<1x128xf32, #tpu.memory_space<vmem>>, vector<1x128xf32>
    %7 = vector.broadcast %6 : vector<1x128xf32> to vector<16x128xf32>
    %8 = arith.addf %5, %7 : vector<16x128xf32>
    %c0_6 = arith.constant 0 : index
    %c0_7 = arith.constant 0 : index
    %9 = vector.load %arg9[%c0_6, %c0_7] : memref<16x128xf32, #tpu.memory_space<vmem>>, vector<16x128xf32>
    tpu.vector_store %arg9[%c0_6, %c0_7], %8 {strides = array<i32>} : memref<16x128xf32, #tpu.memory_space<vmem>>, vector<16x128xf32>,
    return
  }
  func.func @transform_1(%arg0: i32, %arg1: memref<16xi32, #tpu.memory_space<smem>>) -> (i32, i32, i32) {
    %c0_i32 = arith.constant 0 : i32
    %c0_i32_0 = arith.constant 0 : i32
    %c0_i32_1 = arith.constant 0 : i32
    %c0_i32_2 = arith.constant 0 : i32
    return %c0_i32, %c0_i32_0, %c0_i32_1 : i32, i32, i32
  }
  func.func @transform_2(%arg0: i32, %arg1: memref<16xi32, #tpu.memory_space<smem>>) -> (i32, i32, i32) {
    %c0_i32 = arith.constant 0 : i32
    %c0_i32_0 = arith.constant 0 : i32
    %c0_i32_1 = arith.constant 0 : i32
    %c0_i32_2 = arith.constant 0 : i32
    return %c0_i32, %c0_i32_0, %c0_i32_1 : i32, i32, i32
  }
  func.func @transform_3(%arg0: i32, %arg1: memref<16xi32, #tpu.memory_space<smem>>) -> (i32, i32) {
    %c0_i32 = arith.constant 0 : i32
    %c0_i32_0 = arith.constant 0 : i32
    return %c0_i32, %arg0 : i32, i32
  }
  func.func @transform_4(%arg0: i32, %arg1: memref<16xi32, #tpu.memory_space<smem>>) -> (i32, i32) {
    %c0_i32 = arith.constant 0 : i32
    %c0_i32_0 = arith.constant 0 : i32
    return %c0_i32, %arg0 : i32, i32
  }
  func.func @transform_5(%arg0: i32, %arg1: memref<16xi32, #tpu.memory_space<smem>>) -> (i32, i32, i32) {
    %c0_i32 = arith.constant 0 : i32
    %c0_i32_0 = arith.constant 0 : i32
    %c0_i32_1 = arith.constant 0 : i32
    %c0_i32_2 = arith.constant 0 : i32
    return %c0_i32, %c0_i32_0, %c0_i32_1 : i32, i32, i32
  }
  func.func @transform_6(%arg0: i32, %arg1: memref<16xi32, #tpu.memory_space<smem>>) -> (i32, i32, i32) {
    %c0_i32 = arith.constant 0 : i32
    %c0_i32_0 = arith.constant 0 : i32
    %c0_i32_1 = arith.constant 0 : i32
    %c0_i32_2 = arith.constant 0 : i32
    return %c0_i32, %c0_i32_0, %c0_i32_1 : i32, i32, i32
  }
  func.func @transform_7(%arg0: i32, %arg1: memref<16xi32, #tpu.memory_space<smem>>) -> (i32, i32) {
    %c0_i32 = arith.constant 0 : i32
    %c0_i32_0 = arith.constant 0 : i32
    return %c0_i32, %arg0 : i32, i32
  }
  func.func @transform_8(%arg0: i32, %arg1: memref<16xi32, #tpu.memory_space<smem>>) -> (i32, i32, i32) {
    %c0_i32 = arith.constant 0 : i32
    %c0_i32_0 = arith.constant 0 : i32
    %c0_i32_1 = arith.constant 0 : i32
    %c0_i32_2 = arith.constant 0 : i32
    return %c0_i32, %c0_i32_0, %c0_i32_1 : i32, i32, i32
  }
  func.func @transform_9(%arg0: i32, %arg1: memref<16xi32, #tpu.memory_space<smem>>) -> (i32, i32, i32) {
    %c0_i32 = arith.constant 0 : i32
    %c0_i32_0 = arith.constant 0 : i32
    %c0_i32_1 = arith.constant 0 : i32
    %c0_i32_2 = arith.constant 0 : i32
    return %c0_i32, %c0_i32_0, %c0_i32_1 : i32, i32, i32
  }
}

</mosaic_0001>

<bundles_post_ra>
// kernel: apply.1
= control target key start
LH: loop header
LB: loop body
LE: loop exit
PB: predicated region body
PF: predicated region fallthrough
CT: control target
= control target key end

     0   :  { %s2071_s0 = inlined_call_operand.vmem [shape: s32[16], index: 0, kind: input, shape index: {}]   ;;  %s2072_s1 = inlined_call_operand.vmem [shape: f32[64,32], index: 1, kind: input, shape index: {}]   ;;  %s2073_s2 = inlined_call_operand.vmem [shape: bf16[2,64,128], index: 2, kind: input, shape index: {}]   ;;  %s2074_s3 = inlined_call_operand.vmem [shape: f32[2,1,128], index: 3, kind: input, shape index: {}]   ;;  %s2075_s4 = inlined_call_operand.vmem [shape: bf16[32,128], index: 4, kind: input, shape index: {}]   ;;  %s2076_s5 = inlined_call_operand.vmem [shape: f32[1,128], index: 5, kind: input, shape index: {}]   ;;  %s2077_s6 = inlined_call_operand.vmem [shape: f32[2,16,32], index: 6, kind: input, shape index: {}, may-alias: {6,9}]   ;;  %s2078_s7 = inlined_call_operand.vmem [shape: f32[2,16,32], index: 7, kind: input, shape index: {}, may-alias: {7,10}]   ;;  %s2079_s8 = inlined_call_operand.vmem [shape: f32[16,128], index: 8, kind: output, shape index: {0}]   ;;  %s2080_s9 = inlined_call_operand.vmem [shape: f32[2,16,32], index: 9, kind: output, shape index: {1}, may-alias: {6,9}]   ;;  %s2081_s10 = inlined_call_operand.vmem [shape: f32[2,16,32], index: 10, kind: output, shape index: {2}, may-alias: {7,10}]  }
   0x1   :  { %s16_s15 = sshll.u32 %s2071_s0, 4  ;;  %s17_s15 = int_to_ptr.vmem [resolvable:$true] %s16_s15 }
   0x2   :  { %s1750_s16 = scalar_lea.vmem %s17_s15, 16  ;;  %p1755_p1 = scmp.lt.s32.totalorder %s17_s15, %s17_s15 }
   0x3   :  { %p1751_p0 = scmp.ne.s32.totalorder %s17_s15, %s1750_s16  ;;  %p1756_p2 = scmp.lt.s32.totalorder %s1750_s16, %s1750_s16 }
   0x5   :  { %p1757_p3 = por %p1756_p2, %p1755_p1 }
   0x7   :  { %p1758_p4 = pnand %p1757_p3, %p1751_p0 }
   0x9   :  { %1761 = shalt.err (!%p1758_p4)  }
   0xa   :  { %s1796_s17 = smov [#allocation7]  }
   0xb   :  { %19 = dma.vmem_to_smem %s17_s15, 16, %s1796_s17, [#allocation6] }
   0xc   :  { %1762 = dma.done.wait [#allocation6], 16 }
   0xd   :  { %1763 = vsyncadd [#allocation6], 4294967280 }
   0xe   :  { %21 = sfence }
   0xf   :  { %s39_s18 = sld [smem:[#allocation7]] }
  0x15   :  { %s40_s21 = scalar_lea.vmem %s2072_s1, %s39_s18 }
  0x16   :  { %v58_v0 = vld [vmem:[%s40_s21] sm:$0x1] }
  0x17   :  { %59 = vst [vmem:[#allocation2] sm:$0x1] %v58_v0 }
  0x18   :  { %84 = vsyncadd [#allocation5], 16  ;;  %s1588_s0 = sld [smem:[#allocation7 + $0x1]] }
  0x1e   :  { %s86_s24 = scalar_lea.vmem %s2072_s1, %s1588_s0 }
  0x1f   :  { %v106_v1 = vld [vmem:[%s86_s24] sm:$0x1] }
  0x20   :  { %107 = vst [vmem:[#allocation2 + $0x1] sm:$0x1] %v106_v1 }
  0x21   :  { %132 = vsyncadd [#allocation5 + $0x1], 16  ;;  %s1589_s25 = sld [smem:[#allocation7 + $0x2]] }
  0x27   :  { %s134_s28 = scalar_lea.vmem %s2072_s1, %s1589_s25 }
  0x28   :  { %v154_v2 = vld [vmem:[%s134_s28] sm:$0x1] }
  0x29   :  { %155 = vst [vmem:[#allocation2 + $0x2] sm:$0x1] %v154_v2 }
  0x2a   :  { %180 = vsyncadd [#allocation5 + $0x2], 16  ;;  %s1590_s29 = sld [smem:[#allocation7 + $0x3]] }
  0x30   :  { %s182_s12 = scalar_lea.vmem %s2072_s1, %s1590_s29 }
  0x31   :  { %v202_v3 = vld [vmem:[%s182_s12] sm:$0x1] }
  0x32   :  { %203 = vst [vmem:[#allocation2 + $0x3] sm:$0x1] %v202_v3 }
  0x33   :  { %228 = vsyncadd [#allocation5 + $0x3], 16  ;;  %s1591_s13 = sld [smem:[#allocation7 + $0x4]] }
  0x39   :  { %s230_s16 = scalar_lea.vmem %s2072_s1, %s1591_s13 }
  0x3a   :  { %v250_v4 = vld [vmem:[%s230_s16] sm:$0x1] }
  0x3b   :  { %251 = vst [vmem:[#allocation2 + $0x4] sm:$0x1] %v250_v4 }
  0x3c   :  { %276 = vsyncadd [#allocation5 + $0x4], 16  ;;  %s1592_s17 = sld [smem:[#allocation7 + $0x5]] }
  0x42   :  { %s278_s20 = scalar_lea.vmem %s2072_s1, %s1592_s17 }
  0x43   :  { %v298_v5 = vld [vmem:[%s278_s20] sm:$0x1] }
  0x44   :  { %299 = vst [vmem:[#allocation2 + $0x5] sm:$0x1] %v298_v5 }
  0x45   :  { %324 = vsyncadd [#allocation5 + $0x5], 16  ;;  %s1593_s21 = sld [smem:[#allocation7 + $0x6]] }
  0x4b   :  { %s326_s23 = scalar_lea.vmem %s2072_s1, %s1593_s21 }
  0x4c   :  { %v346_v6 = vld [vmem:[%s326_s23] sm:$0x1] }
  0x4d   :  { %347 = vst [vmem:[#allocation2 + $0x6] sm:$0x1] %v346_v6 }
  0x4e   :  { %372 = vsyncadd [#allocation5 + $0x6], 16  ;;  %s1594_s24 = sld [smem:[#allocation7 + $0x7]] }
  0x54   :  { %s374_s27 = scalar_lea.vmem %s2072_s1, %s1594_s24 }
  0x55   :  { %v394_v7 = vld [vmem:[%s374_s27] sm:$0x1] }
  0x56   :  { %395 = vst [vmem:[#allocation2 + $0x7] sm:$0x1] %v394_v7 }
  0x57   :  { %420 = vsyncadd [#allocation5 + $0x7], 16  ;;  %s1595_s28 = sld [smem:[#allocation7 + $0x8]] }
  0x5d   :  { %s422_s11 = scalar_lea.vmem %s2072_s1, %s1595_s28 }
  0x5e   :  { %v442_v8 = vld [vmem:[%s422_s11] sm:$0x1] }
  0x5f   :  { %443 = vst [vmem:[#allocation2 + $0x8] sm:$0x1] %v442_v8 }
  0x60   :  { %468 = vsyncadd [#allocation5 + $0x8], 16  ;;  %s1596_s12 = sld [smem:[#allocation7 + $0x9]] }
  0x66   :  { %s470_s15 = scalar_lea.vmem %s2072_s1, %s1596_s12 }
  0x67   :  { %v490_v9 = vld [vmem:[%s470_s15] sm:$0x1] }
  0x68   :  { %491 = vst [vmem:[#allocation2 + $0x9] sm:$0x1] %v490_v9 }
  0x69   :  { %516 = vsyncadd [#allocation5 + $0x9], 16  ;;  %s1597_s16 = sld [smem:[#allocation7 + $0xa]] }
  0x6f   :  { %s518_s19 = scalar_lea.vmem %s2072_s1, %s1597_s16 }
  0x70   :  { %v538_v10 = vld [vmem:[%s518_s19] sm:$0x1] }
  0x71   :  { %539 = vst [vmem:[#allocation2 + $0xa] sm:$0x1] %v538_v10 }
  0x72   :  { %564 = vsyncadd [#allocation5 + $0xa], 16  ;;  %s1598_s20 = sld [smem:[#allocation7 + $0xb]] }
  0x78   :  { %s566_s22 = scalar_lea.vmem %s2072_s1, %s1598_s20 }
  0x79   :  { %v586_v11 = vld [vmem:[%s566_s22] sm:$0x1] }
  0x7a   :  { %587 = vst [vmem:[#allocation2 + $0xb] sm:$0x1] %v586_v11 }
  0x7b   :  { %612 = vsyncadd [#allocation5 + $0xb], 16  ;;  %s1599_s23 = sld [smem:[#allocation7 + $0xc]] }
  0x81   :  { %s614_s26 = scalar_lea.vmem %s2072_s1, %s1599_s23 }
  0x82   :  { %v634_v12 = vld [vmem:[%s614_s26] sm:$0x1] }
  0x83   :  { %635 = vst [vmem:[#allocation2 + $0xc] sm:$0x1] %v634_v12 }
  0x84   :  { %660 = vsyncadd [#allocation5 + $0xc], 16  ;;  %s1600_s27 = sld [smem:[#allocation7 + $0xd]] }
  0x8a   :  { %s662_s30 = scalar_lea.vmem %s2072_s1, %s1600_s27 }
  0x8b   :  { %v682_v13 = vld [vmem:[%s662_s30] sm:$0x1] }
  0x8c   :  { %683 = vst [vmem:[#allocation2 + $0xd] sm:$0x1] %v682_v13 }
  0x8d   :  { %708 = vsyncadd [#allocation5 + $0xd], 16  ;;  %s1601_s11 = sld [smem:[#allocation7 + $0xe]] }
  0x93   :  { %s710_s14 = scalar_lea.vmem %s2072_s1, %s1601_s11 }
  0x94   :  { %v730_v14 = vld [vmem:[%s710_s14] sm:$0x1] }
  0x95   :  { %731 = vst [vmem:[#allocation2 + $0xe] sm:$0x1] %v730_v14 }
  0x96   :  { %756 = vsyncadd [#allocation5 + $0xe], 16  ;;  %s1602_s15 = sld [smem:[#allocation7 + $0xf]] }
  0x9c   :  { %s758_s18 = scalar_lea.vmem %s2072_s1, %s1602_s15 }
  0x9d   :  { %v778_v15 = vld [vmem:[%s758_s18] sm:$0x1] }
  0x9e   :  { %779 = vst [vmem:[#allocation2 + $0xf] sm:$0x1] %v778_v15 }
  0x9f   :  { %804 = vsyncadd [#allocation5 + $0xf], 16  ;;  %vm805_vm0 = vcmask 523264   ;;  %v1797_v16 = vmov 0  }
  0xa0   :  { %806 = vst.msk [vmem:[#allocation3] sm:$0xff] %vm805_vm0, %v1797_v16 }
  0xa1   :  { %1764 = dma.done.wait [#allocation5], 16 }
  0xa2   :  { %1765 = vsyncadd [#allocation5], 4294967280 }
  0xa3   :  { %1766 = dma.done.wait [#allocation5 + $0x1], 16 }
  0xa4   :  { %1767 = vsyncadd [#allocation5 + $0x1], 4294967280 }
  0xa5   :  { %1768 = dma.done.wait [#allocation5 + $0x2], 16 }
  0xa6   :  { %1769 = vsyncadd [#allocation5 + $0x2], 4294967280 }
  0xa7   :  { %1770 = dma.done.wait [#allocation5 + $0x3], 16 }
  0xa8   :  { %1771 = vsyncadd [#allocation5 + $0x3], 4294967280 }
  0xa9   :  { %1772 = dma.done.wait [#allocation5 + $0x4], 16 }
  0xaa   :  { %1773 = vsyncadd [#allocation5 + $0x4], 4294967280 }
  0xab   :  { %1774 = dma.done.wait [#allocation5 + $0x5], 16 }
  0xac   :  { %1775 = vsyncadd [#allocation5 + $0x5], 4294967280 }
  0xad   :  { %1776 = dma.done.wait [#allocation5 + $0x6], 16 }
  0xae   :  { %1777 = vsyncadd [#allocation5 + $0x6], 4294967280 }
  0xaf   :  { %1778 = dma.done.wait [#allocation5 + $0x7], 16 }
  0xb0   :  { %1779 = vsyncadd [#allocation5 + $0x7], 4294967280 }
  0xb1   :  { %1780 = dma.done.wait [#allocation5 + $0x8], 16 }
  0xb2   :  { %1781 = vsyncadd [#allocation5 + $0x8], 4294967280 }
  0xb3   :  { %1782 = dma.done.wait [#allocation5 + $0x9], 16 }
  0xb4   :  { %1783 = vsyncadd [#allocation5 + $0x9], 4294967280 }
  0xb5   :  { %1784 = dma.done.wait [#allocation5 + $0xa], 16 }
  0xb6   :  { %1785 = vsyncadd [#allocation5 + $0xa], 4294967280 }
  0xb7   :  { %1786 = dma.done.wait [#allocation5 + $0xb], 16 }
  0xb8   :  { %1787 = vsyncadd [#allocation5 + $0xb], 4294967280 }
  0xb9   :  { %1788 = dma.done.wait [#allocation5 + $0xc], 16 }
  0xba   :  { %1789 = vsyncadd [#allocation5 + $0xc], 4294967280 }
  0xbb   :  { %1790 = dma.done.wait [#allocation5 + $0xd], 16 }
  0xbc   :  { %1791 = vsyncadd [#allocation5 + $0xd], 4294967280 }
  0xbd   :  { %1792 = dma.done.wait [#allocation5 + $0xe], 16 }
  0xbe   :  { %1793 = vsyncadd [#allocation5 + $0xe], 4294967280 }
  0xbf   :  { %1794 = dma.done.wait [#allocation5 + $0xf], 16 }
  0xc0   :  { %1795 = vsyncadd [#allocation5 + $0xf], 4294967280  ;;  %v1798_v17 = vmov 0.0   ;;  %vm1799_vm1 = vmmov 0   ;;  %v844_v18 = vld [vmem:[%s2077_s6] sm:$0xff]  ;;  %v845_v19 = vld [vmem:[%s2077_s6 + $0x8] sm:$0xff] }
  0xc1   :  { %1669 = vmatprep.subr.bf16.mxu0 %v1798_v17  ;;  %1681 = vmatprep.subr.bf16.mxu1 %v1798_v17  ;;  %v848_v20 = vpack.c.bf16 %v845_v19, %v844_v18  ;;  %v1708_v21 = vld [vmem:[%s2073_s2] sm:$0xff]   ;;  %v1709_v22 = vld [vmem:[%s2073_s2 + $0x8] sm:$0xff]   ;;  %s1800_s25 = smov 32   ;;  %vm842_vm2 = vcmask 261120   ;;  %v1710_v26 = vld [vmem:[%s2073_s2 + $0x10] sm:$0xff]   ;;  %vm853_vm3 = vcmask 523520  }
  0xc2   :  { %1677 = vmatprep.mubr.msk.bf16.mxu0 %vm1799_vm1, %v1798_v17  ;;  %1689 = vmatprep.mubr.msk.bf16.mxu1 %vm1799_vm1, %v1798_v17  ;;  %v839_v23 = vld [vmem:[#allocation2] sm:$0xff]  ;;  %v840_v24 = vld [vmem:[#allocation2 + $0x8] sm:$0xff]  ;;  %v1711_v27 = vld [vmem:[%s2073_s2 + $0x18] sm:$0xff]  }
  0xc3   :  { %850 = vrot.lane.b32.xlu0 %v848_v20, %s1800_s25  ;;  %1670 = vmatpush3.bf16.msra.mxu0 %v1708_v21  ;;  %v841_v25 = vpack.c.bf16 %v840_v24, %v839_v23  ;;  %v1603_v30 = vld [vmem:[%s2074_s3] ss:$0 sm:$0xff]  ;;  %v847_v38 = vld [vmem:[%s2078_s7 + $0x8] sm:$0xff]  ;;  %v1611_v0 = vld [vmem:[%s2077_s6 + $0x10] sm:$0xff] }
  0xc4   :  { %1671 = vmatprep.subr.bf16.mxu0 %v1798_v17  ;;  %v846_v40 = vld [vmem:[%s2078_s7] sm:$0xff]  ;;  %v1713_v62 = vld [vmem:[%s2073_s2 + $0x28] sm:$0xff]   ;;  %v1612_v1 = vld [vmem:[%s2077_s6 + $0x18] sm:$0xff]  ;;  %s1801_s6 = smov 64  }
  0xc5   :  { %843 = vst.msk [vmem:[#allocation3] sm:$0xff] %vm842_vm2, %v841_v25  ;;  %v1712_v61 = vld [vmem:[%s2073_s2 + $0x20] sm:$0xff]   ;;  %v1027_v3 = vpack.c.bf16 %v1612_v1, %v1611_v0  ;;  %v1714_v4 = vld [vmem:[%s2073_s2 + $0x30] sm:$0xff]   ;;  %v1715_v5 = vld [vmem:[%s2073_s2 + $0x38] sm:$0xff]  }
  0xc6   :  { %1682 = vmatpush3.bf16.msra.mxu1 %v1712_v61  ;;  %v1624_v14 = vld [vmem:[%s2074_s3 + $0x1] ss:$0 sm:$0xff]  ;;  %v1613_v23 = vld [vmem:[%s2078_s7 + $0x10] sm:$0xff]  ;;  %v1614_v25 = vld [vmem:[%s2078_s7 + $0x18] sm:$0xff]  ;;  %s1802_s7 = smov 96  }
  0xc7   :  { %1672 = vmatpush3.bf16.msra.mxu0 %v1709_v22  ;;  %1683 = vmatprep.subr.bf16.mxu1 %v1798_v17  ;;  %v1636_v0 = vld [vmem:[%s2076_s5] ss:$0 sm:$0xff] }
  0xc8   :  { %1673 = vmatprep.subr.bf16.mxu0 %v1798_v17 }
  0xca   :  { %1684 = vmatpush3.bf16.msra.mxu1 %v1713_v62 }
  0xcb   :  { %1674 = vmatpush3.bf16.msra.mxu0 %v1710_v26  ;;  %1685 = vmatprep.subr.bf16.mxu1 %v1798_v17 }
  0xcc   :  { %1675 = vmatprep.subr.bf16.mxu0 %v1798_v17 }
  0xce   :  { %1686 = vmatpush3.bf16.msra.mxu1 %v1714_v4 }
  0xcf   :  { %1676 = vmatpush3.bf16.msra.mxu0 %v1711_v27  ;;  %1687 = vmatprep.subr.bf16.mxu1 %v1798_v17 }
  0xd0   :  { %1693 = vmatprep.subr.bf16.mxu0 %v1798_v17 }
  0xd2   :  { %1688 = vmatpush3.bf16.msra.mxu1 %v1715_v5 }
 0x135   :  { %v851_v28 = vpop.permute.xlu0 %850 }
 0x136   :  { %854 = vst.msk [vmem:[#allocation3] sm:$0xff] %vm853_vm3, %v851_v28 }
 0x13d   :  { %v855_v29 = vld [vmem:[#allocation3] sm:$0xff] }
 0x13e   :  { %1678 = vmatmul.mubr.msk.bf16.vlgmr.msra.gmra.mrb[0].mxu0 %vm805_vm0, %v855_v29 }
 0x13f   :  { %1697 = vmatprep.mubr.msk.bf16.mxu0 %vm1799_vm1, %v1798_v17 }
 0x211   :  { %v932_v31 = vpop.f32.mrb[0].mxu0 }
 0x212   :  { %v933_v32 = vadd.f32 %v1603_v30, %v932_v31  ;;  %v1679_v33 = vpop.f32.mrb[1].mxu0 }
 0x213   :  { %v935_v34 = vpop.f32.mrb[2].mxu0 }
 0x214   :  { %1718 = vtanh.f32 %v933_v32  ;;  %v936_v35 = vadd.f32 %v1603_v30, %v935_v34  ;;  %v1680_v36 = vpop.f32.mrb[3].mxu0  ;;  %v1609_v41 = vmul.f32 -1.442695, %v933_v32 }
 0x216   :  { %1720 = vtanh.f32 %v936_v35  ;;  %v1610_v42 = vmul.f32 -1.442695, %v936_v35 }
 0x217   :  { %1722 = vpow2.f32 %v1609_v41 }
 0x218   :  { %1724 = vpow2.f32 %v1610_v42 }
 0x21e   :  { %v1719_v37 = vpop.eup %1718 }
 0x21f   :  { %965 = vrot.lane.b32.xlu0 %v1719_v37, %s1800_s25 }
 0x220   :  { %v1721_v39 = vpop.eup %1720 }
 0x221   :  { %967 = vrot.lane.b32.xlu1 %v1721_v39, %s1800_s25  ;;  %v1723_v43 = vpop.eup %1722 }
 0x222   :  { %v1725_v44 = vpop.eup %1724  ;;  %v945_v45 = vadd.f32 1.0, %v1723_v43 }
 0x223   :  { %957 = vrot.lane.b32.xlu0 %v847_v38, %s1800_s25  ;;  %v946_v46 = vadd.f32 1.0, %v1725_v44 }
 0x224   :  { %1726 = vrcp.f32 %v945_v45 }
 0x225   :  { %955 = vrot.lane.b32.xlu1 %v846_v40, %s1800_s25  ;;  %1728 = vrcp.f32 %v946_v46 }
 0x22e   :  { %v1727_v47 = vpop.eup %1726 }
 0x22f   :  { %v1729_v50 = vpop.eup %1728 }
 0x291   :  { %v966_v48 = vpop.permute.xlu0 %965 }
 0x292   :  { %v971_v49 = vmul.f32 %v1727_v47, %v966_v48  ;;  %v1716_v48 = vld [vmem:[%s2075_s4] sm:$0xff]  }
 0x293   :  { %v968_v51 = vpop.permute.xlu1 %967  ;;  %1694 = vmatpush3.bf16.msra.mxu0 %v1716_v48 }
 0x294   :  { %975 = vrot.lane.b32.xlu1 %v971_v49, %s1800_s25  ;;  %v972_v52 = vmul.f32 %v1729_v50, %v968_v51  ;;  %1695 = vmatprep.subr.bf16.mxu0 %v1798_v17  ;;  %v1717_v49 = vld [vmem:[%s2075_s4 + $0x8] sm:$0xff]  }
 0x295   :  { %v958_v54 = vpop.permute.xlu0 %957 }
 0x296   :  { %977 = vrot.lane.b32.xlu0 %v972_v52, %s1800_s25  ;;  %v962_v58 = vmul.f32 %v1729_v50, %v958_v54 }
 0x297   :  { %v956_v53 = vpop.permute.xlu1 %955  ;;  %1696 = vmatpush3.bf16.msra.mxu0 %v1717_v49 }
 0x298   :  { %v961_v55 = vmul.f32 %v1727_v47, %v956_v53 }
 0x306   :  { %v976_v56 = vpop.permute.xlu1 %975 }
 0x307   :  { %v1959_v57 = vadd.f32 %v976_v56, %v961_v55 }
 0x308   :  { %v978_v59 = vpop.permute.xlu0 %977 }
 0x309   :  { %1730 = vtanh.f32 %v1959_v57  ;;  %v1962_v60 = vadd.f32 %v978_v59, %v962_v58 }
 0x30b   :  { %1732 = vtanh.f32 %v1962_v60 }
 0x313   :  { %v1731_v63 = vpop.eup %1730 }
 0x314   :  { %987 = vrot.lane.b32.xlu1 %v1731_v63, %s1800_s25 }
 0x315   :  { %v1733_v2 = vpop.eup %1732 }
 0x316   :  { %989 = vrot.lane.b32.xlu0 %v1733_v2, %s1800_s25 }
 0x31a   :  { %1029 = vrot.lane.b32.xlu0 %v1027_v3, %s1800_s25 }
 0x386   :  { %v988_v6 = vpop.permute.xlu1 %987 }
 0x387   :  { %v993_v8 = vmul.f32 %v1727_v47, %v988_v6 }
 0x388   :  { %v990_v7 = vpop.permute.xlu0 %989 }
 0x389   :  { %v1989_v9 = vmul.f32 %v1729_v50, %v990_v7 }
 0x38b   :  { %v1015_v10 = vpack.c.bf16 %v1989_v9, %v993_v8 }
 0x38c   :  { %v1030_v11 = vpop.permute.xlu0 %1029 }
 0x38d   :  { %1017 = vrot.lane.b32.xlu1 %v1015_v10, %s1801_s6 }
 0x3ff   :  { %v1018_v12 = vpop.permute.xlu1 %1017 }
 0x400   :  { %1020 = vst.msk [vmem:[#allocation3] sm:$0xff] %vm842_vm2, %v1018_v12 }
 0x401   :  { %1032 = vst.msk [vmem:[#allocation3] sm:$0xff] %vm853_vm3, %v1030_v11 }
 0x408   :  { %v1033_v13 = vld [vmem:[#allocation3] sm:$0xff] }
 0x409   :  { %1690 = vmatmul.mubr.msk.bf16.vlgmr.msra.gmra.mrb[0].mxu1 %vm805_vm0, %v1033_v13 }
 0x4dc   :  { %v1112_v15 = vpop.f32.mrb[0].mxu1 }
 0x4dd   :  { %v1113_v16 = vadd.f32 %v1624_v14, %v1112_v15  ;;  %v1691_v18 = vpop.f32.mrb[1].mxu1 }
 0x4de   :  { %v1115_v19 = vpop.f32.mrb[2].mxu1 }
 0x4df   :  { %1734 = vtanh.f32 %v1113_v16  ;;  %v1116_v20 = vadd.f32 %v1624_v14, %v1115_v19  ;;  %v1692_v21 = vpop.f32.mrb[3].mxu1  ;;  %v1630_v26 = vmul.f32 -1.442695, %v1113_v16 }
 0x4e1   :  { %1736 = vtanh.f32 %v1116_v20  ;;  %v1631_v27 = vmul.f32 -1.442695, %v1116_v20 }
 0x4e2   :  { %1738 = vpow2.f32 %v1630_v26 }
 0x4e3   :  { %1740 = vpow2.f32 %v1631_v27 }
 0x4e9   :  { %v1735_v22 = vpop.eup %1734 }
 0x4ea   :  { %1145 = vrot.lane.b32.xlu1 %v1735_v22, %s1800_s25 }
 0x4eb   :  { %v1737_v24 = vpop.eup %1736 }
 0x4ec   :  { %1147 = vrot.lane.b32.xlu0 %v1737_v24, %s1800_s25  ;;  %v1739_v28 = vpop.eup %1738 }
 0x4ed   :  { %v1741_v29 = vpop.eup %1740  ;;  %v1125_v30 = vadd.f32 1.0, %v1739_v28 }
 0x4ee   :  { %1135 = vrot.lane.b32.xlu1 %v1613_v23, %s1800_s25  ;;  %v1126_v31 = vadd.f32 1.0, %v1741_v29 }
 0x4ef   :  { %1742 = vrcp.f32 %v1125_v30 }
 0x4f0   :  { %1137 = vrot.lane.b32.xlu0 %v1614_v25, %s1800_s25  ;;  %1744 = vrcp.f32 %v1126_v31 }
 0x4f9   :  { %v1743_v32 = vpop.eup %1742 }
 0x4fa   :  { %v1745_v35 = vpop.eup %1744 }
 0x55c   :  { %v1146_v33 = vpop.permute.xlu1 %1145 }
 0x55d   :  { %v1151_v34 = vmul.f32 %v1743_v32, %v1146_v33 }
 0x55e   :  { %v1148_v36 = vpop.permute.xlu0 %1147 }
 0x55f   :  { %1155 = vrot.lane.b32.xlu1 %v1151_v34, %s1800_s25  ;;  %v1152_v37 = vmul.f32 %v1745_v35, %v1148_v36 }
 0x560   :  { %v1136_v38 = vpop.permute.xlu1 %1135 }
 0x561   :  { %1157 = vrot.lane.b32.xlu0 %v1152_v37, %s1800_s25  ;;  %v1141_v39 = vmul.f32 %v1743_v32, %v1136_v38 }
 0x562   :  { %v1138_v40 = vpop.permute.xlu0 %1137 }
 0x563   :  { %v1142_v43 = vmul.f32 %v1745_v35, %v1138_v40 }
 0x5d1   :  { %v1156_v41 = vpop.permute.xlu1 %1155 }
 0x5d2   :  { %v1161_v42 = vadd.f32 %v1156_v41, %v1141_v39 }
 0x5d3   :  { %v1158_v44 = vpop.permute.xlu0 %1157 }
 0x5d4   :  { %1746 = vtanh.f32 %v1161_v42  ;;  %v1162_v45 = vadd.f32 %v1158_v44, %v1142_v43 }
 0x5d6   :  { %1748 = vtanh.f32 %v1162_v45 }
 0x5de   :  { %v1747_v46 = vpop.eup %1746 }
 0x5df   :  { %1167 = vrot.lane.b32.xlu1 %v1747_v46, %s1800_s25 }
 0x5e0   :  { %v1749_v47 = vpop.eup %1748 }
 0x5e1   :  { %1169 = vrot.lane.b32.xlu0 %v1749_v47, %s1800_s25 }
 0x5e5   :  { %997 = vrot.lane.b32.xlu0 %v993_v8, %s1801_s6 }
 0x5e9   :  { %1007 = vrot.lane.b32.xlu0 %v1959_v57, %s1802_s7 }
 0x651   :  { %v1168_v50 = vpop.permute.xlu1 %1167 }
 0x652   :  { %v1173_v51 = vmul.f32 %v1743_v32, %v1168_v50 }
 0x653   :  { %v1170_v52 = vpop.permute.xlu0 %1169 }
 0x654   :  { %1177 = vrot.lane.b32.xlu0 %v1173_v51, %s1801_s6  ;;  %v1174_v53 = vmul.f32 %v1745_v35, %v1170_v52 }
 0x656   :  { %v1197_v54 = vpack.c.bf16 %v1174_v53, %v1173_v51 }
 0x657   :  { %v998_v55 = vpop.permute.xlu0 %997 }
 0x658   :  { %1188 = vrot.lane.b32.xlu0 %v1161_v42, %s1802_s7  ;;  %1003 = vst.msk [vmem:[%s2080_s9] sm:$0xff] %vm842_vm2, %v998_v55  ;;  %1199 = vrot.lane.b32.xlu1 %v1197_v54, %s1801_s6 }
 0x65b   :  { %v1008_v17 = vpop.permute.xlu0 %1007 }
 0x65c   :  { %1013 = vst.msk [vmem:[%s2081_s10] sm:$0xff] %vm842_vm2, %v1008_v17  ;;  %999 = vrot.lane.b32.xlu1 %v1989_v9, %s1801_s6 }
 0x660   :  { %1009 = vrot.lane.b32.xlu1 %v1962_v60, %s1802_s7 }
 0x664   :  { %1179 = vrot.lane.b32.xlu1 %v1174_v53, %s1801_s6 }
 0x668   :  { %1190 = vrot.lane.b32.xlu1 %v1162_v45, %s1802_s7 }
 0x6c6   :  { %v1178_v56 = vpop.permute.xlu0 %1177 }
 0x6c7   :  { %1632 = vst.msk [vmem:[%s2080_s9 + $0x10] sm:$0xff] %vm842_vm2, %v1178_v56 }
 0x6ca   :  { %v1189_v57 = vpop.permute.xlu0 %1188  ;;  %v1200_v58 = vpop.permute.xlu1 %1199 }
 0x6cb   :  { %1634 = vst.msk [vmem:[%s2081_s10 + $0x10] sm:$0xff] %vm842_vm2, %v1189_v57  ;;  %1202 = vst.msk [vmem:[#allocation4] sm:$0xff] %vm842_vm2, %v1200_v58 }
 0x6ce   :  { %v1000_v59 = vpop.permute.xlu1 %999 }
 0x6cf   :  { %1004 = vst.msk [vmem:[%s2080_s9 + $0x8] sm:$0xff] %vm842_vm2, %v1000_v59 }
 0x6d2   :  { %v1010_v60 = vpop.permute.xlu1 %1009  ;;  %v1203_v61 = vld [vmem:[#allocation4] sm:$0xff] }
 0x6d3   :  { %1014 = vst.msk [vmem:[%s2081_s10 + $0x8] sm:$0xff] %vm842_vm2, %v1010_v60  ;;  %1698 = vmatmul.mubr.msk.bf16.vlgmr.msra.gmra.mrb[4].mxu0 %vm842_vm2, %v1203_v61 }
 0x6d6   :  { %v1180_v62 = vpop.permute.xlu1 %1179 }
 0x6d7   :  { %1633 = vst.msk [vmem:[%s2080_s9 + $0x18] sm:$0xff] %vm842_vm2, %v1180_v62 }
 0x6da   :  { %v1191_v63 = vpop.permute.xlu1 %1190 }
 0x6db   :  { %1635 = vst.msk [vmem:[%s2081_s10 + $0x18] sm:$0xff] %vm842_vm2, %v1191_v63 }
 0x7a6   :  { %v1265_v1 = vpop.f32.mrb[4].mxu0 }
 0x7a7   :  { %v1266_v2 = vadd.f32 %v1636_v0, %v1265_v1  ;;  %v1699_v3 = vpop.f32.mrb[5].mxu0 }
 0x7a8   :  { %v1268_v4 = vpop.f32.mrb[6].mxu0 }
 0x7a9   :  { %1272 = vst [vmem:[%s2079_s8] sm:$0xff] %v1266_v2  ;;  %v1269_v5 = vadd.f32 %v1636_v0, %v1268_v4  ;;  %v1700_v6 = vpop.f32.mrb[7].mxu0 }
 0x7ab   :  { %1273 = vst [vmem:[%s2079_s8 + $0x8] sm:$0xff] %v1269_v5 }
 0x7ac   :  { %1286 = vsyncmov [#allocation5] }
 0x7af   :  { %s1287_s10 = vpop.sfrf %1286 }
 0x7b0   :  { %p1640_p5 = scmp.ne.s32.totalorder %s1287_s10, 0 }
 0x7b2   :  { %1291 = shalt.err (%p1640_p5)  }
 0x7b3   :  { %1293 = vsyncmov [#allocation5 + $0x1] }
 0x7b6   :  { %s1294_s5 = vpop.sfrf %1293 }
 0x7b7   :  { %p1641_p6 = scmp.ne.s32.totalorder %s1294_s5, 0 }
 0x7b9   :  { %1298 = shalt.err (%p1641_p6)  }
 0x7ba   :  { %1300 = vsyncmov [#allocation5 + $0x2] }
 0x7bd   :  { %s1301_s30 = vpop.sfrf %1300 }
 0x7be   :  { %p1642_p7 = scmp.ne.s32.totalorder %s1301_s30, 0 }
 0x7c0   :  { %1305 = shalt.err (%p1642_p7)  }
 0x7c1   :  { %1307 = vsyncmov [#allocation5 + $0x3] }
 0x7c4   :  { %s1308_s7 = vpop.sfrf %1307 }
 0x7c5   :  { %p1643_p8 = scmp.ne.s32.totalorder %s1308_s7, 0 }
 0x7c7   :  { %1312 = shalt.err (%p1643_p8)  }
 0x7c8   :  { %1314 = vsyncmov [#allocation5 + $0x4] }
 0x7cb   :  { %s1315_s11 = vpop.sfrf %1314 }
 0x7cc   :  { %p1644_p9 = scmp.ne.s32.totalorder %s1315_s11, 0 }
 0x7ce   :  { %1319 = shalt.err (%p1644_p9)  }
 0x7cf   :  { %1321 = vsyncmov [#allocation5 + $0x5] }
 0x7d2   :  { %s1322_s8 = vpop.sfrf %1321 }
 0x7d3   :  { %p1645_p10 = scmp.ne.s32.totalorder %s1322_s8, 0 }
 0x7d5   :  { %1326 = shalt.err (%p1645_p10)  }
 0x7d6   :  { %1328 = vsyncmov [#allocation5 + $0x6] }
 0x7d9   :  { %s1329_s12 = vpop.sfrf %1328 }
 0x7da   :  { %p1646_p11 = scmp.ne.s32.totalorder %s1329_s12, 0 }
 0x7dc   :  { %1333 = shalt.err (%p1646_p11)  }
 0x7dd   :  { %1335 = vsyncmov [#allocation5 + $0x7] }
 0x7e0   :  { %s1336_s13 = vpop.sfrf %1335 }
 0x7e1   :  { %p1647_p12 = scmp.ne.s32.totalorder %s1336_s13, 0 }
 0x7e3   :  { %1340 = shalt.err (%p1647_p12)  }
 0x7e4   :  { %1342 = vsyncmov [#allocation5 + $0x8] }
 0x7e7   :  { %s1343_s14 = vpop.sfrf %1342 }
 0x7e8   :  { %p1648_p13 = scmp.ne.s32.totalorder %s1343_s14, 0 }
 0x7ea   :  { %1347 = shalt.err (%p1648_p13)  }
 0x7eb   :  { %1349 = vsyncmov [#allocation5 + $0x9] }
 0x7ee   :  { %s1350_s25 = vpop.sfrf %1349 }
 0x7ef   :  { %p1649_p0 = scmp.ne.s32.totalorder %s1350_s25, 0 }
 0x7f1   :  { %1354 = shalt.err (%p1649_p0)  }
 0x7f2   :  { %1356 = vsyncmov [#allocation5 + $0xa] }
 0x7f5   :  { %s1357_s15 = vpop.sfrf %1356 }
 0x7f6   :  { %p1650_p1 = scmp.ne.s32.totalorder %s1357_s15, 0 }
 0x7f8   :  { %1361 = shalt.err (%p1650_p1)  }
 0x7f9   :  { %1363 = vsyncmov [#allocation5 + $0xb] }
 0x7fc   :  { %s1364_s4 = vpop.sfrf %1363 }
 0x7fd   :  { %p1651_p2 = scmp.ne.s32.totalorder %s1364_s4, 0 }
 0x7ff   :  { %1368 = shalt.err (%p1651_p2)  }
 0x800   :  { %1370 = vsyncmov [#allocation5 + $0xc] }
 0x803   :  { %s1371_s16 = vpop.sfrf %1370 }
 0x804   :  { %p1652_p3 = scmp.ne.s32.totalorder %s1371_s16, 0 }
 0x806   :  { %1375 = shalt.err (%p1652_p3)  }
 0x807   :  { %1377 = vsyncmov [#allocation5 + $0xd] }
 0x80a   :  { %s1378_s17 = vpop.sfrf %1377 }
 0x80b   :  { %p1653_p4 = scmp.ne.s32.totalorder %s1378_s17, 0 }
 0x80d   :  { %1382 = shalt.err (%p1653_p4)  }
 0x80e   :  { %1384 = vsyncmov [#allocation5 + $0xe] }
 0x811   :  { %s1385_s18 = vpop.sfrf %1384 }
 0x812   :  { %p1654_p5 = scmp.ne.s32.totalorder %s1385_s18, 0 }
 0x814   :  { %1389 = shalt.err (%p1654_p5)  }
 0x815   :  { %1391 = vsyncmov [#allocation5 + $0xf] }
 0x818   :  { %s1392_s1 = vpop.sfrf %1391 }
 0x819   :  { %p1655_p6 = scmp.ne.s32.totalorder %s1392_s1, 0 }
 0x81b   :  { %1396 = shalt.err (%p1655_p6)  }

</bundles_post_ra>
